<compile_context>
chip_gen: v5e
topology: v5e:2x2
jax: 0.10.0
libtpu: 0.0.40
codegen_flags: <defaults>
</compile_context>

<pallas_src>
import jax
import jax.numpy as jnp
import numpy as np
from jax.experimental import pallas as pl
from jax.experimental.pallas import tpu as pltpu


# ------------------------- fused bi-direction LSTM recurrence --------------------------

def _bilstm_chunk_kernel(x_ref, wih_ref, whh_ref, b_ref, out_ref, h_sc, c_sc):
    # x_ref: (TC, 2, B, E)   wih: (2, E, 4H)   whh: (2, H, 4H)   b: (2, 1, 4H)
    # out_ref: (TC, 2, B, H) h_sc / c_sc: (2, B, H) carried across time chunks.
    @pl.when(pl.program_id(0) == 0)
    def _():
        h_sc[...] = jnp.zeros_like(h_sc)
        c_sc[...] = jnp.zeros_like(c_sc)

    H = h_sc.shape[-1]
    tc = x_ref.shape[0]
    wih = wih_ref[...]
    whh = whh_ref[...]
    bias = b_ref[...]

    # Lane mask selecting the `g` block (tanh) of the 4H-wide gate vreg; hoisted
    # out of the time loop so it is built once per chunk, not per step.
    gate_shape = (wih.shape[0], h_sc.shape[1], 4 * H)
    lane = jax.lax.broadcasted_iota(jnp.int32, gate_shape, 2)
    g_mask = (lane >= 2 * H) & (lane < 3 * H)

    def step(k, carry):
        h, c = carry
        x_t = x_ref[k]                                               # (2, B, E)
        gates = (jnp.einsum('dbe,def->dbf', x_t, wih,
                            preferred_element_type=jnp.float32)
                 + jnp.einsum('dbh,dhf->dbf', h, whh,
                              preferred_element_type=jnp.float32)
                 + bias)                                             # (2, B, 4H)
        # Full-vreg sigmoid + full-vreg tanh + one VPU select instead of 4 narrow
        # per-gate EUP calls.
        act = jnp.where(g_mask, jnp.tanh(gates), jax.nn.sigmoid(gates))
        i = act[..., 0 * H:1 * H]
        f = act[..., 1 * H:2 * H]
        g = act[..., 2 * H:3 * H]
        o = act[..., 3 * H:4 * H]
        c_new = f * c + i * g
        h_new = o * jnp.tanh(c_new)
        out_ref[k] = h_new.astype(out_ref.dtype)                     # VMEM; HBM writeback is one slab per chunk
        return (h_new, c_new)

    h, c = jax.lax.fori_loop(0, tc, step, (h_sc[...], c_sc[...]), unroll=True)
    h_sc[...] = h
    c_sc[...] = c


def _pick_time_chunk(T, max_chunk=32):
    tc = min(T, max_chunk)
    while T % tc != 0:
        tc -= 1
    return tc


def bilstm_layer_pallas(x_tdbe, w_ih, w_hh, b, t_chunk):
    """x_tdbe: (T, 2, B, in_dim) -> (T, 2, B, H). Both directions in one kernel."""
    T, D2, B, E = x_tdbe.shape
    H = w_hh.shape[1]
    return pl.pallas_call(
        _bilstm_chunk_kernel,
        out_shape=jax.ShapeDtypeStruct((T, 2, B, H), jnp.float32),
        grid_spec=pltpu.PrefetchScalarGridSpec(
            num_scalar_prefetch=0,
            grid=(T // t_chunk,),
            in_specs=[
                pl.BlockSpec((t_chunk, 2, B, E), lambda t: (t, 0, 0, 0)),
                # Constant-index weights; at toy sizes double-buffering them is noise
                # (single-buffering via pipeline_mode only matters at real H).
                pl.BlockSpec((2, E, 4 * H), lambda t: (0, 0, 0)),
                pl.BlockSpec((2, H, 4 * H), lambda t: (0, 0, 0)),
                pl.BlockSpec((2, 1, 4 * H), lambda t: (0, 0, 0)),
            ],
            out_specs=pl.BlockSpec((t_chunk, 2, B, H), lambda t: (t, 0, 0, 0)),
            scratch_shapes=[pltpu.VMEM((2, B, H), jnp.float32),
                            pltpu.VMEM((2, B, H), jnp.float32)],
        ),
        compiler_params=pltpu.CompilerParams(dimension_semantics=("arbitrary",)),
    )(x_tdbe, w_ih, w_hh, b)


def run_bilstm(xv, xv_r, lstm_params, lstm_r_params):
    """xv, xv_r: (B, T, E) batch-first. Returns stacked outputs (T, 2, B, H)."""
    B, T, E = xv.shape
    t_chunk = _pick_time_chunk(T)
    x = jnp.transpose(jnp.stack([xv, xv_r], axis=0), (2, 0, 1, 3))   # (T, 2, B, E)
    for (pf, pr) in zip(lstm_params, lstm_r_params):
        w_ih = jnp.stack([pf[0], pr[0]], axis=0)                     # (2, in_dim, 4H)
        w_hh = jnp.stack([pf[1], pr[1]], axis=0)                     # (2, H, 4H)
        H = pf[1].shape[0]
        b = jnp.stack([pf[2].reshape(1, 4 * H), pr[2].reshape(1, 4 * H)], axis=0)
        x = bilstm_layer_pallas(x, w_ih, w_hh, b, t_chunk)
    return x                                                         # (T, 2, B, H)


# --------------------- Linear -> ReLU -> Linear -> logsoftmax ---------------------

def _head_kernel(x_ref, w1_ref, b1_ref, w2_ref, b2_ref, out_ref):
    h = jnp.dot(x_ref[...], w1_ref[...], preferred_element_type=jnp.float32) + b1_ref[...]
    h = jnp.maximum(h, 0.0)
    logits = jnp.dot(h, w2_ref[...], preferred_element_type=jnp.float32) + b2_ref[...]
    m = jnp.max(logits, axis=-1, keepdims=True)
    s = logits - m
    lse = jnp.log(jnp.sum(jnp.exp(s), axis=-1, keepdims=True))
    out_ref[...] = (s - lse).astype(out_ref.dtype)


def mlp_head_pallas(x, w1, b1, w2, b2):
    N, D = x.shape
    H2 = w1.shape[1]
    V = w2.shape[1]
    # Pad vocab dim to a multiple of 128 lanes -> unmasked vst; padded logits get a
    # -1e30 bias so they contribute nothing to the softmax normalizer.
    Vp = ((V + 127) // 128) * 128
    if Vp != V:
        w2p = jnp.concatenate([w2, jnp.zeros((H2, Vp - V), w2.dtype)], axis=1)
        b2p = jnp.concatenate([b2, jnp.full((Vp - V,), -1e30, b2.dtype)], axis=0)
    else:
        w2p, b2p = w2, b2
    tile_n = 8 if N % 8 == 0 else N
    out = pl.pallas_call(
        _head_kernel,
        out_shape=jax.ShapeDtypeStruct((N, Vp), jnp.float32),
        grid_spec=pltpu.PrefetchScalarGridSpec(
            num_scalar_prefetch=0,
            grid=(N // tile_n,),
            in_specs=[
                pl.BlockSpec((tile_n, D), lambda i: (i, 0)),
                pl.BlockSpec((D, H2), lambda i: (0, 0)),
                pl.BlockSpec((1, H2), lambda i: (0, 0)),
                pl.BlockSpec((H2, Vp), lambda i: (0, 0)),
                pl.BlockSpec((1, Vp), lambda i: (0, 0)),
            ],
            out_specs=pl.BlockSpec((tile_n, Vp), lambda i: (i, 0)),
        ),
        compiler_params=pltpu.CompilerParams(dimension_semantics=("parallel",)),
    )(x, w1, b1.reshape(1, H2), w2p, b2p.reshape(1, Vp))
    return out[:, :V]


# ------------------------------ full forward -------------------------------

def lstm_model_forward(tokens, tokens_r, params):
    """tokens, tokens_r: (B, T) int32. Returns (B*T, dict_size+1) log-probs."""
    B, T = tokens.shape
    H = params["h1_dim"]
    emb = params["embedding"]
    xv = jnp.take(emb, tokens, axis=0)                               # (B, T, E)
    xv_r = jnp.take(emb, tokens_r, axis=0)

    out = run_bilstm(xv, xv_r, params["lstm"], params["lstm_r"])     # (T, 2, B, H)
    out1 = out[:, 0]                                                 # (T, B, H) fwd
    out2 = out[:, 1]                                                 # (T, B, H) rev

    zeros = jnp.zeros((1, B, H), jnp.float32)
    # [0-vector] + out1[:T-1] per sentence (time-major shift)
    h1_in1 = jnp.concatenate([zeros, out1[:-1]], axis=0)
    # reversed([0-vector] + out2[:T-1]) per sentence
    h1_in2 = jnp.flip(jnp.concatenate([zeros, out2[:-1]], axis=0), axis=0)
    h1_input = jnp.concatenate([h1_in1, h1_in2], axis=-1)            # (T, B, 2H)
    h1_input = jnp.transpose(h1_input, (1, 0, 2)).reshape(B * T, 2 * H)

    return mlp_head_pallas(h1_input, params["w1"], params["b1"],
                           params["w2"], params["b2"])


# ------------------------------ reference (pure JAX) ------------------------------

def _ref_lstm_layer(x_bte, w_ih, w_hh, b):
    B, T, _ = x_bte.shape
    H = w_hh.shape[0]

    def step(carry, x_t):
        h, c = carry
        gates = x_t @ w_ih + h @ w_hh + b
        i = jax.nn.sigmoid(gates[:, :H])
        f = jax.nn.sigmoid(gates[:, H:2 * H])
        g = jnp.tanh(gates[:, 2 * H:3 * H])
        o = jax.nn.sigmoid(gates[:, 3 * H:])
        c = f * c + i * g
        h = o * jnp.tanh(c)
        return (h, c), h

    _, ys = jax.lax.scan(step, (jnp.zeros((B, H)), jnp.zeros((B, H))),
                         jnp.transpose(x_bte, (1, 0, 2)))
    return jnp.transpose(ys, (1, 0, 2))


def ref_forward(tokens, tokens_r, params):
    B, T = tokens.shape
    H = params["h1_dim"]
    xv = jnp.take(params["embedding"], tokens, axis=0)
    xv_r = jnp.take(params["embedding"], tokens_r, axis=0)
    o1, o2 = xv, xv_r
    for (w_ih, w_hh, b) in params["lstm"]:
        o1 = _ref_lstm_layer(o1, w_ih, w_hh, b)
    for (w_ih, w_hh, b) in params["lstm_r"]:
        o2 = _ref_lstm_layer(o2, w_ih, w_hh, b)
    zeros = jnp.zeros((B, 1, H), jnp.float32)
    h1 = jnp.concatenate([zeros, o1[:, :T - 1, :]], axis=1)
    h2 = jnp.flip(jnp.concatenate([zeros, o2[:, :T - 1, :]], axis=1), axis=1)
    x = jnp.concatenate([h1, h2], axis=-1).reshape(B * T, 2 * H)
    h = jnp.maximum(x @ params["w1"] + params["b1"], 0.0)
    logits = h @ params["w2"] + params["b2"]
    return jax.nn.log_softmax(logits, axis=1)


# ------------------------------ params ------------------------------

def init_params(key, embedding_dim, h1_dim, h2_dim, dict_size, num_lstm_layers):
    V = dict_size + 1
    keys = iter(jax.random.split(key, 4 + 6 * num_lstm_layers + 4))

    def u(k, shape, scale):
        return jax.random.uniform(k, shape, jnp.float32, -scale, scale)

    params = {"h1_dim": h1_dim}
    params["embedding"] = jax.random.normal(next(keys), (V, embedding_dim), jnp.float32)

    def make_lstm():
        layers = []
        s = 1.0 / np.sqrt(h1_dim)
        for layer in range(num_lstm_layers):
            in_dim = embedding_dim if layer == 0 else h1_dim
            w_ih = u(next(keys), (in_dim, 4 * h1_dim), s)
            w_hh = u(next(keys), (h1_dim, 4 * h1_dim), s)
            b = u(next(keys), (4 * h1_dim,), s)        # b_ih + b_hh folded into one bias
            layers.append((w_ih, w_hh, b))
        return layers

    params["lstm"] = make_lstm()
    params["lstm_r"] = make_lstm()

    s1 = 1.0 / np.sqrt(2 * h1_dim)
    params["w1"] = u(next(keys), (2 * h1_dim, h2_dim), s1)
    params["b1"] = u(next(keys), (h2_dim,), s1)
    s2 = 1.0 / np.sqrt(h2_dim)
    params["w2"] = u(next(keys), (h2_dim, V), s2)
    params["b2"] = u(next(keys), (V,), s2)
    return params


# ------------------------------ main ------------------------------

if __name__ == "__main__":
    embedding_dim = 32
    lstm_dim = 32          # unused by the reference module as well
    h1_dim = 32            # LSTM hidden size
    h2_dim = 32
    dropout = 0.0
    dict_size = 63         # vocab = dict_size + 1 = 64
    num_lstm_layers = 2
    B, T = 2, 8

    key = jax.random.PRNGKey(0)
    k_tok, k_par = jax.random.split(key)
    tokens = jax.random.randint(k_tok, (B, T), 0, dict_size + 1, dtype=jnp.int32)
    tokens_r = jnp.flip(tokens, axis=1)  # reversed sentences (equal lengths, no padding)

    params = init_params(k_par, embedding_dim, h1_dim, h2_dim, dict_size, num_lstm_layers)

    out = lstm_model_forward(tokens, tokens_r, params)
    out = jax.block_until_ready(out)

    ref = jax.block_until_ready(ref_forward(tokens, tokens_r, params))
    np.testing.assert_allclose(np.asarray(out), np.asarray(ref), rtol=2e-5, atol=2e-5)
    assert out.shape == (B * T, dict_size + 1)

    print("KERNEL_OK")
</pallas_src>

<mosaic_0001>
module attributes {stable_mosaic.version = 11 : i64} {
  func.func @_bilstm_chunk_kernel(%arg0: i32, %arg1: memref<8x2x2x32xf32, #tpu.memory_space<vmem>>, %arg2: memref<2x32x128xf32, #tpu.memory_space<vmem>>, %arg3: memref<2x32x128xf32, #tpu.memory_space<vmem>>, %arg4: memref<2x1x128xf32, #tpu.memory_space<vmem>>, %arg5: memref<8x2x2x32xf32, #tpu.memory_space<vmem>>, %arg6: memref<2x2x32xf32, #tpu.memory_space<vmem>>, %arg7: memref<2x2x32xf32, #tpu.memory_space<vmem>>) attributes {dimension_semantics = [#tpu.dimension_semantics<arbitrary>], iteration_bounds = array<i64: 1>, scalar_prefetch = 0 : i64, scratch_operands = 2 : i64, tpu.core_type = #tpu.core_type<tc>, window_params = [{transform_indices = @transform_0, window_bounds = array<i64: 8, 2, 2, 32>}, {pipeline_mode = #tpu.pipeline_mode<synchronous>, transform_indices = @transform_1, window_bounds = array<i64: 2, 32, 128>}, {pipeline_mode = #tpu.pipeline_mode<synchronous>, transform_indices = @transform_2, window_bounds = array<i64: 2, 32, 128>}, {pipeline_mode = #tpu.pipeline_mode<synchronous>, transform_indices = @transform_3, window_bounds = array<i64: 2, 1, 128>}, {transform_indices = @transform_4, window_bounds = array<i64: 8, 2, 2, 32>}]} {
    %c0_i32 = arith.constant 0 : i32
    %0 = arith.cmpi eq, %arg0, %c0_i32 : i32
    %1 = arith.extui %0 : i1 to i32
    %c0_i32_0 = arith.constant 0 : i32
    %2 = arith.cmpi ne, %1, %c0_i32_0 : i32
    scf.if %2 {
      %cst_93 = arith.constant 0.000000e+00 : f32
      %240 = vector.broadcast %cst_93 : f32 to vector<2x2x32xf32>
      %c0_94 = arith.constant 0 : index
      %c0_95 = arith.constant 0 : index
      %c0_96 = arith.constant 0 : index
      %241 = vector.load %arg6[%c0_94, %c0_95, %c0_96] : memref<2x2x32xf32, #tpu.memory_space<vmem>>, vector<2x2x32xf32>
      tpu.vector_store %arg6[%c0_94, %c0_95, %c0_96], %240 {strides = array<i32>} : memref<2x2x32xf32, #tpu.memory_space<vmem>>, vector<2x2x32xf32>,
      %cst_97 = arith.constant 0.000000e+00 : f32
      %242 = vector.broadcast %cst_97 : f32 to vector<2x2x32xf32>
      %c0_98 = arith.constant 0 : index
      %c0_99 = arith.constant 0 : index
      %c0_100 = arith.constant 0 : index
      %243 = vector.load %arg7[%c0_98, %c0_99, %c0_100] : memref<2x2x32xf32, #tpu.memory_space<vmem>>, vector<2x2x32xf32>
      tpu.vector_store %arg7[%c0_98, %c0_99, %c0_100], %242 {strides = array<i32>} : memref<2x2x32xf32, #tpu.memory_space<vmem>>, vector<2x2x32xf32>,
    } else {
    }
    %c0 = arith.constant 0 : index
    %c0_1 = arith.constant 0 : index
    %c0_2 = arith.constant 0 : index
    %3 = vector.load %arg2[%c0, %c0_1, %c0_2] : memref<2x32x128xf32, #tpu.memory_space<vmem>>, vector<2x32x128xf32>
    %c0_3 = arith.constant 0 : index
    %c0_4 = arith.constant 0 : index
    %c0_5 = arith.constant 0 : index
    %4 = vector.load %arg3[%c0_3, %c0_4, %c0_5] : memref<2x32x128xf32, #tpu.memory_space<vmem>>, vector<2x32x128xf32>
    %c0_6 = arith.constant 0 : index
    %c0_7 = arith.constant 0 : index
    %c0_8 = arith.constant 0 : index
    %5 = vector.load %arg4[%c0_6, %c0_7, %c0_8] : memref<2x1x128xf32, #tpu.memory_space<vmem>>, vector<2x1x128xf32>
    %6 = tpu.iota {dimensions = array<i32: 2>} : vector<2x2x128xi32>
    %c64_i32 = arith.constant 64 : i32
    %7 = vector.broadcast %c64_i32 : i32 to vector<2x2x128xi32>
    %8 = arith.cmpi sge, %6, %7 : vector<2x2x128xi32>
    %c96_i32 = arith.constant 96 : i32
    %9 = vector.broadcast %c96_i32 : i32 to vector<2x2x128xi32>
    %10 = arith.cmpi slt, %6, %9 : vector<2x2x128xi32>
    %11 = arith.andi %8, %10 : vector<2x2x128xi1>
    %c0_9 = arith.constant 0 : index
    %c0_10 = arith.constant 0 : index
    %c0_11 = arith.constant 0 : index
    %12 = vector.load %arg6[%c0_9, %c0_10, %c0_11] : memref<2x2x32xf32, #tpu.memory_space<vmem>>, vector<2x2x32xf32>
    %c0_12 = arith.constant 0 : index
    %c0_13 = arith.constant 0 : index
    %c0_14 = arith.constant 0 : index
    %13 = vector.load %arg7[%c0_12, %c0_13, %c0_14] : memref<2x2x32xf32, #tpu.memory_space<vmem>>, vector<2x2x32xf32>
    %c0_i32_15 = arith.constant 0 : i32
    %14 = arith.index_cast %c0_i32_15 : i32 to index
    %c0_16 = arith.constant 0 : index
    %c0_17 = arith.constant 0 : index
    %c0_18 = arith.constant 0 : index
    %15 = vector.load %arg1[%14, %c0_16, %c0_17, %c0_18] : memref<8x2x2x32xf32, #tpu.memory_space<vmem>>, vector<1x2x2x32xf32>
    %16 = vector.shape_cast %15 : vector<1x2x2x32xf32> to vector<2x2x32xf32>
    "tpu.trace_start"() <{level = 10 : i32, message = "dbe,def->dbf"}> : () -> ()
    %cst = arith.constant dense<0.000000e+00> : vector<2x2x128xf32>
    %17 = tpu.matmul %16, %3, %cst {dimension_numbers = #tpu.dot_dimension_numbers<[2], [1], [1], [2], [0, 0, 0, 1, 1, 2], [0], [0]>} : vector<2x2x32xf32>, vector<2x32x128xf32>, vector<2x2x128xf32> -> vector<2x2x128xf32>
    "tpu.trace_stop"() : () -> ()
    "tpu.trace_start"() <{level = 10 : i32, message = "dbh,dhf->dbf"}> : () -> ()
    %cst_19 = arith.constant dense<0.000000e+00> : vector<2x2x128xf32>
    %18 = tpu.matmul %12, %4, %cst_19 {dimension_numbers = #tpu.dot_dimension_numbers<[2], [1], [1], [2], [0, 0, 0, 1, 1, 2], [0], [0]>} : vector<2x2x32xf32>, vector<2x32x128xf32>, vector<2x2x128xf32> -> vector<2x2x128xf32>
    "tpu.trace_stop"() : () -> ()
    %19 = arith.addf %17, %18 : vector<2x2x128xf32>
    %20 = vector.broadcast %5 : vector<2x1x128xf32> to vector<2x2x128xf32>
    %21 = arith.addf %19, %20 : vector<2x2x128xf32>
    %22 = math.tanh %21 : vector<2x2x128xf32>
    %23 = arith.negf %21 : vector<2x2x128xf32>
    %24 = math.exp %23 : vector<2x2x128xf32>
    %cst_20 = arith.constant 1.000000e+00 : f32
    %25 = vector.broadcast %cst_20 : f32 to vector<2x2x128xf32>
    %26 = arith.addf %25, %24 : vector<2x2x128xf32>
    %27 = arith.divf %25, %26 : vector<2x2x128xf32>
    %28 = arith.select %11, %22, %27 : vector<2x2x128xi1>, vector<2x2x128xf32>
    %29 = vector.extract_strided_slice %28 {offsets = [0, 0, 0], sizes = [2, 2, 32], strides = [1, 1, 1]} : vector<2x2x128xf32> to vector<2x2x32xf32>
    %30 = vector.extract_strided_slice %28 {offsets = [0, 0, 32], sizes = [2, 2, 32], strides = [1, 1, 1]} : vector<2x2x128xf32> to vector<2x2x32xf32>
    %31 = vector.extract_strided_slice %28 {offsets = [0, 0, 64], sizes = [2, 2, 32], strides = [1, 1, 1]} : vector<2x2x128xf32> to vector<2x2x32xf32>
    %32 = vector.extract_strided_slice %28 {offsets = [0, 0, 96], sizes = [2, 2, 32], strides = [1, 1, 1]} : vector<2x2x128xf32> to vector<2x2x32xf32>
    %33 = arith.mulf %30, %13 : vector<2x2x32xf32>
    %34 = arith.mulf %29, %31 : vector<2x2x32xf32>
    %35 = arith.addf %33, %34 : vector<2x2x32xf32>
    %36 = math.tanh %35 : vector<2x2x32xf32>
    %37 = arith.mulf %32, %36 : vector<2x2x32xf32>
    %38 = arith.index_cast %c0_i32_15 : i32 to index
    %c0_21 = arith.constant 0 : index
    %c0_22 = arith.constant 0 : index
    %c0_23 = arith.constant 0 : index
    %39 = vector.load %arg5[%38, %c0_21, %c0_22, %c0_23] : memref<8x2x2x32xf32, #tpu.memory_space<vmem>>, vector<1x2x2x32xf32>
    %40 = vector.shape_cast %39 : vector<1x2x2x32xf32> to vector<2x2x32xf32>
    %41 = vector.shape_cast %37 : vector<2x2x32xf32> to vector<1x2x2x32xf32>
    tpu.vector_store %arg5[%38, %c0_21, %c0_22, %c0_23], %41 {strides = array<i32>} : memref<8x2x2x32xf32, #tpu.memory_space<vmem>>, vector<1x2x2x32xf32>,
    %c1_i32 = arith.constant 1 : i32
    %42 = arith.index_cast %c1_i32 : i32 to index
    %c0_24 = arith.constant 0 : index
    %c0_25 = arith.constant 0 : index
    %c0_26 = arith.constant 0 : index
    %43 = vector.load %arg1[%42, %c0_24, %c0_25, %c0_26] : memref<8x2x2x32xf32, #tpu.memory_space<vmem>>, vector<1x2x2x32xf32>
    %44 = vector.shape_cast %43 : vector<1x2x2x32xf32> to vector<2x2x32xf32>
    "tpu.trace_start"() <{level = 10 : i32, message = "dbe,def->dbf"}> : () -> ()
    %cst_27 = arith.constant dense<0.000000e+00> : vector<2x2x128xf32>
    %45 = tpu.matmul %44, %3, %cst_27 {dimension_numbers = #tpu.dot_dimension_numbers<[2], [1], [1], [2], [0, 0, 0, 1, 1, 2], [0], [0]>} : vector<2x2x32xf32>, vector<2x32x128xf32>, vector<2x2x128xf32> -> vector<2x2x128xf32>
    "tpu.trace_stop"() : () -> ()
    "tpu.trace_start"() <{level = 10 : i32, message = "dbh,dhf->dbf"}> : () -> ()
    %cst_28 = arith.constant dense<0.000000e+00> : vector<2x2x128xf32>
    %46 = tpu.matmul %37, %4, %cst_28 {dimension_numbers = #tpu.dot_dimension_numbers<[2], [1], [1], [2], [0, 0, 0, 1, 1, 2], [0], [0]>} : vector<2x2x32xf32>, vector<2x32x128xf32>, vector<2x2x128xf32> -> vector<2x2x128xf32>
    "tpu.trace_stop"() : () -> ()
    %47 = arith.addf %45, %46 : vector<2x2x128xf32>
    %48 = vector.broadcast %5 : vector<2x1x128xf32> to vector<2x2x128xf32>
    %49 = arith.addf %47, %48 : vector<2x2x128xf32>
    %50 = math.tanh %49 : vector<2x2x128xf32>
    %51 = arith.negf %49 : vector<2x2x128xf32>
    %52 = math.exp %51 : vector<2x2x128xf32>
    %cst_29 = arith.constant 1.000000e+00 : f32
    %53 = vector.broadcast %cst_29 : f32 to vector<2x2x128xf32>
    %54 = arith.addf %53, %52 : vector<2x2x128xf32>
    %55 = arith.divf %53, %54 : vector<2x2x128xf32>
    %56 = arith.select %11, %50, %55 : vector<2x2x128xi1>, vector<2x2x128xf32>
    %57 = vector.extract_strided_slice %56 {offsets = [0, 0, 0], sizes = [2, 2, 32], strides = [1, 1, 1]} : vector<2x2x128xf32> to vector<2x2x32xf32>
    %58 = vector.extract_strided_slice %56 {offsets = [0, 0, 32], sizes = [2, 2, 32], strides = [1, 1, 1]} : vector<2x2x128xf32> to vector<2x2x32xf32>
    %59 = vector.extract_strided_slice %56 {offsets = [0, 0, 64], sizes = [2, 2, 32], strides = [1, 1, 1]} : vector<2x2x128xf32> to vector<2x2x32xf32>
    %60 = vector.extract_strided_slice %56 {offsets = [0, 0, 96], sizes = [2, 2, 32], strides = [1, 1, 1]} : vector<2x2x128xf32> to vector<2x2x32xf32>
    %61 = arith.mulf %58, %35 : vector<2x2x32xf32>
    %62 = arith.mulf %57, %59 : vector<2x2x32xf32>
    %63 = arith.addf %61, %62 : vector<2x2x32xf32>
    %64 = math.tanh %63 : vector<2x2x32xf32>
    %65 = arith.mulf %60, %64 : vector<2x2x32xf32>
    %66 = arith.index_cast %c1_i32 : i32 to index
    %c0_30 = arith.constant 0 : index
    %c0_31 = arith.constant 0 : index
    %c0_32 = arith.constant 0 : index
    %67 = vector.load %arg5[%66, %c0_30, %c0_31, %c0_32] : memref<8x2x2x32xf32, #tpu.memory_space<vmem>>, vector<1x2x2x32xf32>
    %68 = vector.shape_cast %67 : vector<1x2x2x32xf32> to vector<2x2x32xf32>
    %69 = vector.shape_cast %65 : vector<2x2x32xf32> to vector<1x2x2x32xf32>
    tpu.vector_store %arg5[%66, %c0_30, %c0_31, %c0_32], %69 {strides = array<i32>} : memref<8x2x2x32xf32, #tpu.memory_space<vmem>>, vector<1x2x2x32xf32>,
    %c2_i32 = arith.constant 2 : i32
    %70 = arith.index_cast %c2_i32 : i32 to index
    %c0_33 = arith.constant 0 : index
    %c0_34 = arith.constant 0 : index
    %c0_35 = arith.constant 0 : index
    %71 = vector.load %arg1[%70, %c0_33, %c0_34, %c0_35] : memref<8x2x2x32xf32, #tpu.memory_space<vmem>>, vector<1x2x2x32xf32>
    %72 = vector.shape_cast %71 : vector<1x2x2x32xf32> to vector<2x2x32xf32>
    "tpu.trace_start"() <{level = 10 : i32, message = "dbe,def->dbf"}> : () -> ()
    %cst_36 = arith.constant dense<0.000000e+00> : vector<2x2x128xf32>
    %73 = tpu.matmul %72, %3, %cst_36 {dimension_numbers = #tpu.dot_dimension_numbers<[2], [1], [1], [2], [0, 0, 0, 1, 1, 2], [0], [0]>} : vector<2x2x32xf32>, vector<2x32x128xf32>, vector<2x2x128xf32> -> vector<2x2x128xf32>
    "tpu.trace_stop"() : () -> ()
    "tpu.trace_start"() <{level = 10 : i32, message = "dbh,dhf->dbf"}> : () -> ()
    %cst_37 = arith.constant dense<0.000000e+00> : vector<2x2x128xf32>
    %74 = tpu.matmul %65, %4, %cst_37 {dimension_numbers = #tpu.dot_dimension_numbers<[2], [1], [1], [2], [0, 0, 0, 1, 1, 2], [0], [0]>} : vector<2x2x32xf32>, vector<2x32x128xf32>, vector<2x2x128xf32> -> vector<2x2x128xf32>
    "tpu.trace_stop"() : () -> ()
    %75 = arith.addf %73, %74 : vector<2x2x128xf32>
    %76 = vector.broadcast %5 : vector<2x1x128xf32> to vector<2x2x128xf32>
    %77 = arith.addf %75, %76 : vector<2x2x128xf32>
    %78 = math.tanh %77 : vector<2x2x128xf32>
    %79 = arith.negf %77 : vector<2x2x128xf32>
    %80 = math.exp %79 : vector<2x2x128xf32>
    %cst_38 = arith.constant 1.000000e+00 : f32
    %81 = vector.broadcast %cst_38 : f32 to vector<2x2x128xf32>
    %82 = arith.addf %81, %80 : vector<2x2x128xf32>
    %83 = arith.divf %81, %82 : vector<2x2x128xf32>
    %84 = arith.select %11, %78, %83 : vector<2x2x128xi1>, vector<2x2x128xf32>
    %85 = vector.extract_strided_slice %84 {offsets = [0, 0, 0], sizes = [2, 2, 32], strides = [1, 1, 1]} : vector<2x2x128xf32> to vector<2x2x32xf32>
    %86 = vector.extract_strided_slice %84 {offsets = [0, 0, 32], sizes = [2, 2, 32], strides = [1, 1, 1]} : vector<2x2x128xf32> to vector<2x2x32xf32>
    %87 = vector.extract_strided_slice %84 {offsets = [0, 0, 64], sizes = [2, 2, 32], strides = [1, 1, 1]} : vector<2x2x128xf32> to vector<2x2x32xf32>
    %88 = vector.extract_strided_slice %84 {offsets = [0, 0, 96], sizes = [2, 2, 32], strides = [1, 1, 1]} : vector<2x2x128xf32> to vector<2x2x32xf32>
    %89 = arith.mulf %86, %63 : vector<2x2x32xf32>
    %90 = arith.mulf %85, %87 : vector<2x2x32xf32>
    %91 = arith.addf %89, %90 : vector<2x2x32xf32>
    %92 = math.tanh %91 : vector<2x2x32xf32>
    %93 = arith.mulf %88, %92 : vector<2x2x32xf32>
    %94 = arith.index_cast %c2_i32 : i32 to index
    %c0_39 = arith.constant 0 : index
    %c0_40 = arith.constant 0 : index
    %c0_41 = arith.constant 0 : index
    %95 = vector.load %arg5[%94, %c0_39, %c0_40, %c0_41] : memref<8x2x2x32xf32, #tpu.memory_space<vmem>>, vector<1x2x2x32xf32>
    %96 = vector.shape_cast %95 : vector<1x2x2x32xf32> to vector<2x2x32xf32>
    %97 = vector.shape_cast %93 : vector<2x2x32xf32> to vector<1x2x2x32xf32>
    tpu.vector_store %arg5[%94, %c0_39, %c0_40, %c0_41], %97 {strides = array<i32>} : memref<8x2x2x32xf32, #tpu.memory_space<vmem>>, vector<1x2x2x32xf32>,
    %c3_i32 = arith.constant 3 : i32
    %98 = arith.index_cast %c3_i32 : i32 to index
    %c0_42 = arith.constant 0 : index
    %c0_43 = arith.constant 0 : index
    %c0_44 = arith.constant 0 : index
    %99 = vector.load %arg1[%98, %c0_42, %c0_43, %c0_44] : memref<8x2x2x32xf32, #tpu.memory_space<vmem>>, vector<1x2x2x32xf32>
    %100 = vector.shape_cast %99 : vector<1x2x2x32xf32> to vector<2x2x32xf32>
    "tpu.trace_start"() <{level = 10 : i32, message = "dbe,def->dbf"}> : () -> ()
    %cst_45 = arith.constant dense<0.000000e+00> : vector<2x2x128xf32>
    %101 = tpu.matmul %100, %3, %cst_45 {dimension_numbers = #tpu.dot_dimension_numbers<[2], [1], [1], [2], [0, 0, 0, 1, 1, 2], [0], [0]>} : vector<2x2x32xf32>, vector<2x32x128xf32>, vector<2x2x128xf32> -> vector<2x2x128xf32>
    "tpu.trace_stop"() : () -> ()
    "tpu.trace_start"() <{level = 10 : i32, message = "dbh,dhf->dbf"}> : () -> ()
    %cst_46 = arith.constant dense<0.000000e+00> : vector<2x2x128xf32>
    %102 = tpu.matmul %93, %4, %cst_46 {dimension_numbers = #tpu.dot_dimension_numbers<[2], [1], [1], [2], [0, 0, 0, 1, 1, 2], [0], [0]>} : vector<2x2x32xf32>, vector<2x32x128xf32>, vector<2x2x128xf32> -> vector<2x2x128xf32>
    "tpu.trace_stop"() : () -> ()
    %103 = arith.addf %101, %102 : vector<2x2x128xf32>
    %104 = vector.broadcast %5 : vector<2x1x128xf32> to vector<2x2x128xf32>
    %105 = arith.addf %103, %104 : vector<2x2x128xf32>
    %106 = math.tanh %105 : vector<2x2x128xf32>
    %107 = arith.negf %105 : vector<2x2x128xf32>
    %108 = math.exp %107 : vector<2x2x128xf32>
    %cst_47 = arith.constant 1.000000e+00 : f32
    %109 = vector.broadcast %cst_47 : f32 to vector<2x2x128xf32>
    %110 = arith.addf %109, %108 : vector<2x2x128xf32>
    %111 = arith.divf %109, %110 : vector<2x2x128xf32>
    %112 = arith.select %11, %106, %111 : vector<2x2x128xi1>, vector<2x2x128xf32>
    %113 = vector.extract_strided_slice %112 {offsets = [0, 0, 0], sizes = [2, 2, 32], strides = [1, 1, 1]} : vector<2x2x128xf32> to vector<2x2x32xf32>
    %114 = vector.extract_strided_slice %112 {offsets = [0, 0, 32], sizes = [2, 2, 32], strides = [1, 1, 1]} : vector<2x2x128xf32> to vector<2x2x32xf32>
    %115 = vector.extract_strided_slice %112 {offsets = [0, 0, 64], sizes = [2, 2, 32], strides = [1, 1, 1]} : vector<2x2x128xf32> to vector<2x2x32xf32>
    %116 = vector.extract_strided_slice %112 {offsets = [0, 0, 96], sizes = [2, 2, 32], strides = [1, 1, 1]} : vector<2x2x128xf32> to vector<2x2x32xf32>
    %117 = arith.mulf %114, %91 : vector<2x2x32xf32>
    %118 = arith.mulf %113, %115 : vector<2x2x32xf32>
    %119 = arith.addf %117, %118 : vector<2x2x32xf32>
    %120 = math.tanh %119 : vector<2x2x32xf32>
    %121 = arith.mulf %116, %120 : vector<2x2x32xf32>
    %122 = arith.index_cast %c3_i32 : i32 to index
    %c0_48 = arith.constant 0 : index
    %c0_49 = arith.constant 0 : index
    %c0_50 = arith.constant 0 : index
    %123 = vector.load %arg5[%122, %c0_48, %c0_49, %c0_50] : memref<8x2x2x32xf32, #tpu.memory_space<vmem>>, vector<1x2x2x32xf32>
    %124 = vector.shape_cast %123 : vector<1x2x2x32xf32> to vector<2x2x32xf32>
    %125 = vector.shape_cast %121 : vector<2x2x32xf32> to vector<1x2x2x32xf32>
    tpu.vector_store %arg5[%122, %c0_48, %c0_49, %c0_50], %125 {strides = array<i32>} : memref<8x2x2x32xf32, #tpu.memory_space<vmem>>, vector<1x2x2x32xf32>,
    %c4_i32 = arith.constant 4 : i32
    %126 = arith.index_cast %c4_i32 : i32 to index
    %c0_51 = arith.constant 0 : index
    %c0_52 = arith.constant 0 : index
    %c0_53 = arith.constant 0 : index
    %127 = vector.load %arg1[%126, %c0_51, %c0_52, %c0_53] : memref<8x2x2x32xf32, #tpu.memory_space<vmem>>, vector<1x2x2x32xf32>
    %128 = vector.shape_cast %127 : vector<1x2x2x32xf32> to vector<2x2x32xf32>
    "tpu.trace_start"() <{level = 10 : i32, message = "dbe,def->dbf"}> : () -> ()
    %cst_54 = arith.constant dense<0.000000e+00> : vector<2x2x128xf32>
    %129 = tpu.matmul %128, %3, %cst_54 {dimension_numbers = #tpu.dot_dimension_numbers<[2], [1], [1], [2], [0, 0, 0, 1, 1, 2], [0], [0]>} : vector<2x2x32xf32>, vector<2x32x128xf32>, vector<2x2x128xf32> -> vector<2x2x128xf32>
    "tpu.trace_stop"() : () -> ()
    "tpu.trace_start"() <{level = 10 : i32, message = "dbh,dhf->dbf"}> : () -> ()
    %cst_55 = arith.constant dense<0.000000e+00> : vector<2x2x128xf32>
    %130 = tpu.matmul %121, %4, %cst_55 {dimension_numbers = #tpu.dot_dimension_numbers<[2], [1], [1], [2], [0, 0, 0, 1, 1, 2], [0], [0]>} : vector<2x2x32xf32>, vector<2x32x128xf32>, vector<2x2x128xf32> -> vector<2x2x128xf32>
    "tpu.trace_stop"() : () -> ()
    %131 = arith.addf %129, %130 : vector<2x2x128xf32>
    %132 = vector.broadcast %5 : vector<2x1x128xf32> to vector<2x2x128xf32>
    %133 = arith.addf %131, %132 : vector<2x2x128xf32>
    %134 = math.tanh %133 : vector<2x2x128xf32>
    %135 = arith.negf %133 : vector<2x2x128xf32>
    %136 = math.exp %135 : vector<2x2x128xf32>
    %cst_56 = arith.constant 1.000000e+00 : f32
    %137 = vector.broadcast %cst_56 : f32 to vector<2x2x128xf32>
    %138 = arith.addf %137, %136 : vector<2x2x128xf32>
    %139 = arith.divf %137, %138 : vector<2x2x128xf32>
    %140 = arith.select %11, %134, %139 : vector<2x2x128xi1>, vector<2x2x128xf32>
    %141 = vector.extract_strided_slice %140 {offsets = [0, 0, 0], sizes = [2, 2, 32], strides = [1, 1, 1]} : vector<2x2x128xf32> to vector<2x2x32xf32>
    %142 = vector.extract_strided_slice %140 {offsets = [0, 0, 32], sizes = [2, 2, 32], strides = [1, 1, 1]} : vector<2x2x128xf32> to vector<2x2x32xf32>
    %143 = vector.extract_strided_slice %140 {offsets = [0, 0, 64], sizes = [2, 2, 32], strides = [1, 1, 1]} : vector<2x2x128xf32> to vector<2x2x32xf32>
    %144 = vector.extract_strided_slice %140 {offsets = [0, 0, 96], sizes = [2, 2, 32], strides = [1, 1, 1]} : vector<2x2x128xf32> to vector<2x2x32xf32>
    %145 = arith.mulf %142, %119 : vector<2x2x32xf32>
    %146 = arith.mulf %141, %143 : vector<2x2x32xf32>
    %147 = arith.addf %145, %146 : vector<2x2x32xf32>
    %148 = math.tanh %147 : vector<2x2x32xf32>
    %149 = arith.mulf %144, %148 : vector<2x2x32xf32>
    %150 = arith.index_cast %c4_i32 : i32 to index
    %c0_57 = arith.constant 0 : index
    %c0_58 = arith.constant 0 : index
    %c0_59 = arith.constant 0 : index
    %151 = vector.load %arg5[%150, %c0_57, %c0_58, %c0_59] : memref<8x2x2x32xf32, #tpu.memory_space<vmem>>, vector<1x2x2x32xf32>
    %152 = vector.shape_cast %151 : vector<1x2x2x32xf32> to vector<2x2x32xf32>
    %153 = vector.shape_cast %149 : vector<2x2x32xf32> to vector<1x2x2x32xf32>
    tpu.vector_store %arg5[%150, %c0_57, %c0_58, %c0_59], %153 {strides = array<i32>} : memref<8x2x2x32xf32, #tpu.memory_space<vmem>>, vector<1x2x2x32xf32>,
    %c5_i32 = arith.constant 5 : i32
    %154 = arith.index_cast %c5_i32 : i32 to index
    %c0_60 = arith.constant 0 : index
    %c0_61 = arith.constant 0 : index
    %c0_62 = arith.constant 0 : index
    %155 = vector.load %arg1[%154, %c0_60, %c0_61, %c0_62] : memref<8x2x2x32xf32, #tpu.memory_space<vmem>>, vector<1x2x2x32xf32>
    %156 = vector.shape_cast %155 : vector<1x2x2x32xf32> to vector<2x2x32xf32>
    "tpu.trace_start"() <{level = 10 : i32, message = "dbe,def->dbf"}> : () -> ()
    %cst_63 = arith.constant dense<0.000000e+00> : vector<2x2x128xf32>
    %157 = tpu.matmul %156, %3, %cst_63 {dimension_numbers = #tpu.dot_dimension_numbers<[2], [1], [1], [2], [0, 0, 0, 1, 1, 2], [0], [0]>} : vector<2x2x32xf32>, vector<2x32x128xf32>, vector<2x2x128xf32> -> vector<2x2x128xf32>
    "tpu.trace_stop"() : () -> ()
    "tpu.trace_start"() <{level = 10 : i32, message = "dbh,dhf->dbf"}> : () -> ()
    %cst_64 = arith.constant dense<0.000000e+00> : vector<2x2x128xf32>
    %158 = tpu.matmul %149, %4, %cst_64 {dimension_numbers = #tpu.dot_dimension_numbers<[2], [1], [1], [2], [0, 0, 0, 1, 1, 2], [0], [0]>} : vector<2x2x32xf32>, vector<2x32x128xf32>, vector<2x2x128xf32> -> vector<2x2x128xf32>
    "tpu.trace_stop"() : () -> ()
    %159 = arith.addf %157, %158 : vector<2x2x128xf32>
    %160 = vector.broadcast %5 : vector<2x1x128xf32> to vector<2x2x128xf32>
    %161 = arith.addf %159, %160 : vector<2x2x128xf32>
    %162 = math.tanh %161 : vector<2x2x128xf32>
    %163 = arith.negf %161 : vector<2x2x128xf32>
    %164 = math.exp %163 : vector<2x2x128xf32>
    %cst_65 = arith.constant 1.000000e+00 : f32
    %165 = vector.broadcast %cst_65 : f32 to vector<2x2x128xf32>
    %166 = arith.addf %165, %164 : vector<2x2x128xf32>
    %167 = arith.divf %165, %166 : vector<2x2x128xf32>
    %168 = arith.select %11, %162, %167 : vector<2x2x128xi1>, vector<2x2x128xf32>
    %169 = vector.extract_strided_slice %168 {offsets = [0, 0, 0], sizes = [2, 2, 32], strides = [1, 1, 1]} : vector<2x2x128xf32> to vector<2x2x32xf32>
    %170 = vector.extract_strided_slice %168 {offsets = [0, 0, 32], sizes = [2, 2, 32], strides = [1, 1, 1]} : vector<2x2x128xf32> to vector<2x2x32xf32>
    %171 = vector.extract_strided_slice %168 {offsets = [0, 0, 64], sizes = [2, 2, 32], strides = [1, 1, 1]} : vector<2x2x128xf32> to vector<2x2x32xf32>
    %172 = vector.extract_strided_slice %168 {offsets = [0, 0, 96], sizes = [2, 2, 32], strides = [1, 1, 1]} : vector<2x2x128xf32> to vector<2x2x32xf32>
    %173 = arith.mulf %170, %147 : vector<2x2x32xf32>
    %174 = arith.mulf %169, %171 : vector<2x2x32xf32>
    %175 = arith.addf %173, %174 : vector<2x2x32xf32>
    %176 = math.tanh %175 : vector<2x2x32xf32>
    %177 = arith.mulf %172, %176 : vector<2x2x32xf32>
    %178 = arith.index_cast %c5_i32 : i32 to index
    %c0_66 = arith.constant 0 : index
    %c0_67 = arith.constant 0 : index
    %c0_68 = arith.constant 0 : index
    %179 = vector.load %arg5[%178, %c0_66, %c0_67, %c0_68] : memref<8x2x2x32xf32, #tpu.memory_space<vmem>>, vector<1x2x2x32xf32>
    %180 = vector.shape_cast %179 : vector<1x2x2x32xf32> to vector<2x2x32xf32>
    %181 = vector.shape_cast %177 : vector<2x2x32xf32> to vector<1x2x2x32xf32>
    tpu.vector_store %arg5[%178, %c0_66, %c0_67, %c0_68], %181 {strides = array<i32>} : memref<8x2x2x32xf32, #tpu.memory_space<vmem>>, vector<1x2x2x32xf32>,
    %c6_i32 = arith.constant 6 : i32
    %182 = arith.index_cast %c6_i32 : i32 to index
    %c0_69 = arith.constant 0 : index
    %c0_70 = arith.constant 0 : index
    %c0_71 = arith.constant 0 : index
    %183 = vector.load %arg1[%182, %c0_69, %c0_70, %c0_71] : memref<8x2x2x32xf32, #tpu.memory_space<vmem>>, vector<1x2x2x32xf32>
    %184 = vector.shape_cast %183 : vector<1x2x2x32xf32> to vector<2x2x32xf32>
    "tpu.trace_start"() <{level = 10 : i32, message = "dbe,def->dbf"}> : () -> ()
    %cst_72 = arith.constant dense<0.000000e+00> : vector<2x2x128xf32>
    %185 = tpu.matmul %184, %3, %cst_72 {dimension_numbers = #tpu.dot_dimension_numbers<[2], [1], [1], [2], [0, 0, 0, 1, 1, 2], [0], [0]>} : vector<2x2x32xf32>, vector<2x32x128xf32>, vector<2x2x128xf32> -> vector<2x2x128xf32>
    "tpu.trace_stop"() : () -> ()
    "tpu.trace_start"() <{level = 10 : i32, message = "dbh,dhf->dbf"}> : () -> ()
    %cst_73 = arith.constant dense<0.000000e+00> : vector<2x2x128xf32>
    %186 = tpu.matmul %177, %4, %cst_73 {dimension_numbers = #tpu.dot_dimension_numbers<[2], [1], [1], [2], [0, 0, 0, 1, 1, 2], [0], [0]>} : vector<2x2x32xf32>, vector<2x32x128xf32>, vector<2x2x128xf32> -> vector<2x2x128xf32>
    "tpu.trace_stop"() : () -> ()
    %187 = arith.addf %185, %186 : vector<2x2x128xf32>
    %188 = vector.broadcast %5 : vector<2x1x128xf32> to vector<2x2x128xf32>
    %189 = arith.addf %187, %188 : vector<2x2x128xf32>
    %190 = math.tanh %189 : vector<2x2x128xf32>
    %191 = arith.negf %189 : vector<2x2x128xf32>
    %192 = math.exp %191 : vector<2x2x128xf32>
    %cst_74 = arith.constant 1.000000e+00 : f32
    %193 = vector.broadcast %cst_74 : f32 to vector<2x2x128xf32>
    %194 = arith.addf %193, %192 : vector<2x2x128xf32>
    %195 = arith.divf %193, %194 : vector<2x2x128xf32>
    %196 = arith.select %11, %190, %195 : vector<2x2x128xi1>, vector<2x2x128xf32>
    %197 = vector.extract_strided_slice %196 {offsets = [0, 0, 0], sizes = [2, 2, 32], strides = [1, 1, 1]} : vector<2x2x128xf32> to vector<2x2x32xf32>
    %198 = vector.extract_strided_slice %196 {offsets = [0, 0, 32], sizes = [2, 2, 32], strides = [1, 1, 1]} : vector<2x2x128xf32> to vector<2x2x32xf32>
    %199 = vector.extract_strided_slice %196 {offsets = [0, 0, 64], sizes = [2, 2, 32], strides = [1, 1, 1]} : vector<2x2x128xf32> to vector<2x2x32xf32>
    %200 = vector.extract_strided_slice %196 {offsets = [0, 0, 96], sizes = [2, 2, 32], strides = [1, 1, 1]} : vector<2x2x128xf32> to vector<2x2x32xf32>
    %201 = arith.mulf %198, %175 : vector<2x2x32xf32>
    %202 = arith.mulf %197, %199 : vector<2x2x32xf32>
    %203 = arith.addf %201, %202 : vector<2x2x32xf32>
    %204 = math.tanh %203 : vector<2x2x32xf32>
    %205 = arith.mulf %200, %204 : vector<2x2x32xf32>
    %206 = arith.index_cast %c6_i32 : i32 to index
    %c0_75 = arith.constant 0 : index
    %c0_76 = arith.constant 0 : index
    %c0_77 = arith.constant 0 : index
    %207 = vector.load %arg5[%206, %c0_75, %c0_76, %c0_77] : memref<8x2x2x32xf32, #tpu.memory_space<vmem>>, vector<1x2x2x32xf32>
    %208 = vector.shape_cast %207 : vector<1x2x2x32xf32> to vector<2x2x32xf32>
    %209 = vector.shape_cast %205 : vector<2x2x32xf32> to vector<1x2x2x32xf32>
    tpu.vector_store %arg5[%206, %c0_75, %c0_76, %c0_77], %209 {strides = array<i32>} : memref<8x2x2x32xf32, #tpu.memory_space<vmem>>, vector<1x2x2x32xf32>,
    %c7_i32 = arith.constant 7 : i32
    %210 = arith.index_cast %c7_i32 : i32 to index
    %c0_78 = arith.constant 0 : index
    %c0_79 = arith.constant 0 : index
    %c0_80 = arith.constant 0 : index
    %211 = vector.load %arg1[%210, %c0_78, %c0_79, %c0_80] : memref<8x2x2x32xf32, #tpu.memory_space<vmem>>, vector<1x2x2x32xf32>
    %212 = vector.shape_cast %211 : vector<1x2x2x32xf32> to vector<2x2x32xf32>
    "tpu.trace_start"() <{level = 10 : i32, message = "dbe,def->dbf"}> : () -> ()
    %cst_81 = arith.constant dense<0.000000e+00> : vector<2x2x128xf32>
    %213 = tpu.matmul %212, %3, %cst_81 {dimension_numbers = #tpu.dot_dimension_numbers<[2], [1], [1], [2], [0, 0, 0, 1, 1, 2], [0], [0]>} : vector<2x2x32xf32>, vector<2x32x128xf32>, vector<2x2x128xf32> -> vector<2x2x128xf32>
    "tpu.trace_stop"() : () -> ()
    "tpu.trace_start"() <{level = 10 : i32, message = "dbh,dhf->dbf"}> : () -> ()
    %cst_82 = arith.constant dense<0.000000e+00> : vector<2x2x128xf32>
    %214 = tpu.matmul %205, %4, %cst_82 {dimension_numbers = #tpu.dot_dimension_numbers<[2], [1], [1], [2], [0, 0, 0, 1, 1, 2], [0], [0]>} : vector<2x2x32xf32>, vector<2x32x128xf32>, vector<2x2x128xf32> -> vector<2x2x128xf32>
    "tpu.trace_stop"() : () -> ()
    %215 = arith.addf %213, %214 : vector<2x2x128xf32>
    %216 = vector.broadcast %5 : vector<2x1x128xf32> to vector<2x2x128xf32>
    %217 = arith.addf %215, %216 : vector<2x2x128xf32>
    %218 = math.tanh %217 : vector<2x2x128xf32>
    %219 = arith.negf %217 : vector<2x2x128xf32>
    %220 = math.exp %219 : vector<2x2x128xf32>
    %cst_83 = arith.constant 1.000000e+00 : f32
    %221 = vector.broadcast %cst_83 : f32 to vector<2x2x128xf32>
    %222 = arith.addf %221, %220 : vector<2x2x128xf32>
    %223 = arith.divf %221, %222 : vector<2x2x128xf32>
    %224 = arith.select %11, %218, %223 : vector<2x2x128xi1>, vector<2x2x128xf32>
    %225 = vector.extract_strided_slice %224 {offsets = [0, 0, 0], sizes = [2, 2, 32], strides = [1, 1, 1]} : vector<2x2x128xf32> to vector<2x2x32xf32>
    %226 = vector.extract_strided_slice %224 {offsets = [0, 0, 32], sizes = [2, 2, 32], strides = [1, 1, 1]} : vector<2x2x128xf32> to vector<2x2x32xf32>
    %227 = vector.extract_strided_slice %224 {offsets = [0, 0, 64], sizes = [2, 2, 32], strides = [1, 1, 1]} : vector<2x2x128xf32> to vector<2x2x32xf32>
    %228 = vector.extract_strided_slice %224 {offsets = [0, 0, 96], sizes = [2, 2, 32], strides = [1, 1, 1]} : vector<2x2x128xf32> to vector<2x2x32xf32>
    %229 = arith.mulf %226, %203 : vector<2x2x32xf32>
    %230 = arith.mulf %225, %227 : vector<2x2x32xf32>
    %231 = arith.addf %229, %230 : vector<2x2x32xf32>
    %232 = math.tanh %231 : vector<2x2x32xf32>
    %233 = arith.mulf %228, %232 : vector<2x2x32xf32>
    %234 = arith.index_cast %c7_i32 : i32 to index
    %c0_84 = arith.constant 0 : index
    %c0_85 = arith.constant 0 : index
    %c0_86 = arith.constant 0 : index
    %235 = vector.load %arg5[%234, %c0_84, %c0_85, %c0_86] : memref<8x2x2x32xf32, #tpu.memory_space<vmem>>, vector<1x2x2x32xf32>
    %236 = vector.shape_cast %235 : vector<1x2x2x32xf32> to vector<2x2x32xf32>
    %237 = vector.shape_cast %233 : vector<2x2x32xf32> to vector<1x2x2x32xf32>
    tpu.vector_store %arg5[%234, %c0_84, %c0_85, %c0_86], %237 {strides = array<i32>} : memref<8x2x2x32xf32, #tpu.memory_space<vmem>>, vector<1x2x2x32xf32>,
    %c8_i32 = arith.constant 8 : i32
    %c0_87 = arith.constant 0 : index
    %c0_88 = arith.constant 0 : index
    %c0_89 = arith.constant 0 : index
    %238 = vector.load %arg6[%c0_87, %c0_88, %c0_89] : memref<2x2x32xf32, #tpu.memory_space<vmem>>, vector<2x2x32xf32>
    tpu.vector_store %arg6[%c0_87, %c0_88, %c0_89], %233 {strides = array<i32>} : memref<2x2x32xf32, #tpu.memory_space<vmem>>, vector<2x2x32xf32>,
    %c0_90 = arith.constant 0 : index
    %c0_91 = arith.constant 0 : index
    %c0_92 = arith.constant 0 : index
    %239 = vector.load %arg7[%c0_90, %c0_91, %c0_92] : memref<2x2x32xf32, #tpu.memory_space<vmem>>, vector<2x2x32xf32>
    tpu.vector_store %arg7[%c0_90, %c0_91, %c0_92], %231 {strides = array<i32>} : memref<2x2x32xf32, #tpu.memory_space<vmem>>, vector<2x2x32xf32>,
    return
  }
  func.func @transform_0(%arg0: i32) -> (i32, i32, i32, i32) {
    %c0_i32 = arith.constant 0 : i32
    %c0_i32_0 = arith.constant 0 : i32
    %c0_i32_1 = arith.constant 0 : i32
    %c0_i32_2 = arith.constant 0 : i32
    return %arg0, %c0_i32, %c0_i32_0, %c0_i32_1 : i32, i32, i32, i32
  }
  func.func @transform_1(%arg0: i32) -> (i32, i32, i32) {
    %c0_i32 = arith.constant 0 : i32
    %c0_i32_0 = arith.constant 0 : i32
    %c0_i32_1 = arith.constant 0 : i32
    %c0_i32_2 = arith.constant 0 : i32
    return %c0_i32, %c0_i32_0, %c0_i32_1 : i32, i32, i32
  }
  func.func @transform_2(%arg0: i32) -> (i32, i32, i32) {
    %c0_i32 = arith.constant 0 : i32
    %c0_i32_0 = arith.constant 0 : i32
    %c0_i32_1 = arith.constant 0 : i32
    %c0_i32_2 = arith.constant 0 : i32
    return %c0_i32, %c0_i32_0, %c0_i32_1 : i32, i32, i32
  }
  func.func @transform_3(%arg0: i32) -> (i32, i32, i32) {
    %c0_i32 = arith.constant 0 : i32
    %c0_i32_0 = arith.constant 0 : i32
    %c0_i32_1 = arith.constant 0 : i32
    %c0_i32_2 = arith.constant 0 : i32
    return %c0_i32, %c0_i32_0, %c0_i32_1 : i32, i32, i32
  }
  func.func @transform_4(%arg0: i32) -> (i32, i32, i32, i32) {
    %c0_i32 = arith.constant 0 : i32
    %c0_i32_0 = arith.constant 0 : i32
    %c0_i32_1 = arith.constant 0 : i32
    %c0_i32_2 = arith.constant 0 : i32
    return %arg0, %c0_i32, %c0_i32_0, %c0_i32_1 : i32, i32, i32, i32
  }
}

</mosaic_0001>

<bundles_post_ra>
// kernel: tpu_custom_call.1
= control target key start
LH: loop header
LB: loop body
LE: loop exit
PB: predicated region body
PF: predicated region fallthrough
CT: control target
= control target key end

     0   :  { %9 = vsyncpa [#allocation5], 0  ;;  %s2362_s0 = inlined_call_operand.hbm [shape: f32[8,2,2,32], index: 0, kind: input, shape index: {}]   ;;  %s2363_s1 = inlined_call_operand.hbm [shape: f32[2,32,128], index: 1, kind: input, shape index: {}]   ;;  %s2364_s2 = inlined_call_operand.hbm [shape: f32[2,32,128], index: 2, kind: input, shape index: {}]   ;;  %s2365_s3 = inlined_call_operand.vmem [shape: f32[2,1,128], index: 3, kind: input, shape index: {}]   ;;  %s2366_s4 = inlined_call_operand.hbm [shape: f32[8,2,2,32], index: 4, kind: output, shape index: {}]  }
   0x1   :  { %10 = vsyncpa [#allocation8], 0  ;;  %s29_s17 = sshll.u32 %s2363_s1, 4  ;;  %s30_s17 = int_to_ptr.hbm [resolvable:$true] %s29_s17 }
   0x2   :  { %11 = vsyncpa [#allocation6], 0  ;;  %s1914_s18 = smov [#allocation7]   ;;  %s16_s22 = sshll.u32 %s2362_s0, 4  ;;  %s17_s22 = int_to_ptr.hbm [resolvable:$true] %s16_s22 }
   0x3   :  { %s31_s19 = sshll.u32 %s1914_s18, 4  ;;  %s1915_s23 = smov 128   ;;  %s32_s19 = int_to_ptr.vmem [resolvable:$true] %s31_s19 }
   0x4   :  { %s1916_s24 = smov 8   ;;  %s1917_s25 = smov [#allocation4]  }
   0x5   :  { %37 = dma.hbm_to_vmem [thread:$0]  %s30_s17, 1024, %s32_s19, [#allocation8], %s1915_s23, %s1915_s23, %s1916_s24  }
   0x6   :  { %s18_s26 = sshll.u32 %s1917_s25, 4  ;;  %s1918_s27 = smov 32   ;;  %s19_s26 = int_to_ptr.vmem [resolvable:$true] %s18_s26 }
   0x7   :  { %s1919_s28 = smov 2   ;;  %s42_s30 = sshll.u32 %s2364_s2, 4  ;;  %s43_s30 = int_to_ptr.hbm [resolvable:$true] %s42_s30 }
   0x8   :  { %24 = dma.hbm_to_vmem [thread:$0]  %s17_s22, 512, %s19_s26, [#allocation5], %s1918_s27, %s1918_s27, %s1919_s28  }
   0x9   :  { %s1920_s5 = smov [#allocation9]  }
   0xa   :  { %s44_s0 = sshll.u32 %s1920_s5, 4  ;;  %s45_s0 = int_to_ptr.vmem [resolvable:$true] %s44_s0 }
   0xb   :  { %50 = dma.hbm_to_vmem [thread:$0]  %s43_s30, 1024, %s45_s0, [#allocation8], %s1915_s23, %s1915_s23, %s1916_s24  }
   0xc   :  { %1908 = dma.done.wait [#allocation5], 512  }
   0xd   :  { %1909 = vsyncadd [#allocation5], 4294966784 }
   0xe   :  { %1910 = dma.done.wait [#allocation8], 2048  }
   0xf   :  { %1911 = vsyncadd [#allocation8], 4294965248  ;;  %vm69_vm0 = vcmask 254976   ;;  %v1921_v0 = vmov 0.0   ;;  %v1966_v1 = vld [vmem:[#allocation7 + $0x18] sm:$0xff]  ;;  %v1970_v3 = vld [vmem:[#allocation7 + $0x10] sm:$0xff]  ;;  %v92_v39 = vlaneseq }
  0x10   :  { %70 = vst.msk [vmem:[#allocation2] sm:$0x3] %vm69_vm0, %v1921_v0  ;;  %v1968_v2 = vld [vmem:[#allocation7 + $0x38] sm:$0xff]  ;;  %165 = vmatpush.msra.mxu2 %v1966_v1  ;;  %v1974_v4 = vld [vmem:[#allocation7 + $0x30] sm:$0xff]  ;;  %v1976_v5 = vld [vmem:[#allocation7 + $0x8] sm:$0xff]  ;;  %vm103_vm1 = vcmask 261120  }
  0x11   :  { %71 = vst.msk [vmem:[#allocation2 + $0x2] sm:$0x3] %vm69_vm0, %v1921_v0  ;;  %188 = vmatpush.msra.mxu3 %v1968_v2  ;;  %v1978_v6 = vld [vmem:[#allocation7 + $0x28] sm:$0xff]  ;;  %v1980_v7 = vld [vmem:[#allocation9 + $0x18] sm:$0xff]  ;;  %v1986_v9 = vld [vmem:[#allocation7] sm:$0xff]  ;;  %v93_v40 = vand.u32 127, %v92_v39 }
  0x12   :  { %72 = vst.msk [vmem:[#allocation3] sm:$0x3] %vm69_vm0, %v1921_v0  ;;  %v1982_v8 = vld [vmem:[#allocation9 + $0x38] sm:$0xff]  ;;  %166 = vmatpush.msra.mxu2 %v1970_v3  ;;  %119 = vmatpush.msra.mxu0 %v1980_v7  ;;  %v1990_v10 = vld [vmem:[#allocation7 + $0x20] sm:$0xff]  ;;  %v1992_v11 = vld [vmem:[#allocation9 + $0x10] sm:$0xff]  ;;  %s1922_s9 = smov 64  }
  0x13   :  { %73 = vst.msk [vmem:[#allocation3 + $0x2] sm:$0x3] %vm69_vm0, %v1921_v0  ;;  %189 = vmatpush.msra.mxu3 %v1974_v4  ;;  %142 = vmatpush.msra.mxu1 %v1982_v8  ;;  %v1994_v12 = vld [vmem:[#allocation9 + $0x30] sm:$0xff]  ;;  %v101_v13 = vld [vmem:[#allocation4] sm:$0x3]  ;;  %v2000_v15 = vld [vmem:[#allocation9 + $0x8] sm:$0xff] }
  0x14   :  { %167 = vmatpush.msra.mxu2 %v1976_v5  ;;  %v102_v14 = vld [vmem:[#allocation4 + $0x2] sm:$0x3]  ;;  %120 = vmatpush.msra.mxu0 %v1992_v11  ;;  %v2002_v16 = vld [vmem:[#allocation9 + $0x28] sm:$0xff]  ;;  %v2055_v25 = vld [vmem:[%s2365_s3] ss:$0 sm:$0xff]  ;;  %vm94_vm2 = vcmp.ge.s32.totalorder %v93_v40, 64 }
  0x15   :  { %190 = vmatpush.msra.mxu3 %v1978_v6  ;;  %143 = vmatpush.msra.mxu1 %v1994_v12  ;;  %v2008_v18 = vld [vmem:[#allocation9] sm:$0xff]  ;;  %v2060_v26 = vld [vmem:[%s2365_s3 + $0x1] ss:$0 sm:$0xff]  ;;  %vm95_vm3 = vcmp.lt.s32.totalorder %v93_v40, 96  ;;  %s1924_s14 = smov [#allocation10]   ;;  %s1591_s18 = sshll.u32 %s2366_s4, 4  ;;  %s1592_s18 = int_to_ptr.hbm [resolvable:$true] %s1591_s18 }
  0x16   :  { %168 = vmatpush.msra.mxu2 %v1986_v9  ;;  %v2010_v19 = vld [vmem:[#allocation9 + $0x20] sm:$0xff]  ;;  %121 = vmatpush.msra.mxu0 %v2000_v15  ;;  %vm2064_vm5 = vmand %vm94_vm2, %vm95_vm3  ;;  %s1589_s15 = sshll.u32 %s1924_s14, 4  ;;  %s1590_s15 = int_to_ptr.vmem [resolvable:$true] %s1589_s15 }
  0x17   :  { %191 = vmatpush.msra.mxu3 %v1990_v10  ;;  %1607 = vmatmul.msk.f32.vlgmr.msra.gmra.mxu2 %vm103_vm1, %v101_v13  ;;  %v97_v20 = vld [vmem:[#allocation2] sm:$0x3]  ;;  %v301_v39 = vld [vmem:[#allocation4 + $0x6] sm:$0x3] }
  0x18   :  { %1608 = vmatmul.msk.f32.vlgmr.msra.gmra.mxu3 %vm103_vm1, %v102_v14  ;;  %144 = vmatpush.msra.mxu1 %v2002_v16  ;;  %v98_v21 = vld [vmem:[#allocation2 + $0x2] sm:$0x3] }
  0x19   :  { %v99_v17 = vld [vmem:[#allocation3] sm:$0x3]  ;;  %361 = vmatpush.msrb.mxu2 %v1966_v1  ;;  %122 = vmatpush.msra.mxu0 %v2008_v18 }
  0x1a   :  { %248 = vrot.lane.b32.xlu1 %v99_v17, %s1918_s27  ;;  %145 = vmatpush.msra.mxu1 %v2010_v19  ;;  %v100_v22 = vld [vmem:[#allocation3 + $0x2] sm:$0x3] }
  0x1b   :  { %1605 = vmatmul.msk.f32.vlgmr.msra.gmra.mxu0 %vm103_vm1, %v97_v20  ;;  %1606 = vmatmul.msk.f32.vlgmr.msra.gmra.mxu1 %vm103_vm1, %v98_v21 }
  0x1c   :  { %362 = vmatpush.msrb.mxu2 %v1970_v3  ;;  %316 = vmatpush.msrb.mxu0 %v1980_v7 }
  0x1d   :  { %384 = vmatpush.msrb.mxu3 %v1968_v2  ;;  %338 = vmatpush.msrb.mxu1 %v1982_v8 }
  0x1e   :  { %363 = vmatpush.msrb.mxu2 %v1976_v5  ;;  %317 = vmatpush.msrb.mxu0 %v1992_v11 }
  0x1f   :  { %385 = vmatpush.msrb.mxu3 %v1974_v4  ;;  %339 = vmatpush.msrb.mxu1 %v1994_v12 }
  0x20   :  { %364 = vmatpush.msrb.mxu2 %v1986_v9  ;;  %318 = vmatpush.msrb.mxu0 %v2000_v15 }
  0x21   :  { %386 = vmatpush.msrb.mxu3 %v1978_v6  ;;  %340 = vmatpush.msrb.mxu1 %v2002_v16 }
  0x22   :  { %250 = vrot.lane.b32.xlu1 %v100_v22, %s1918_s27  ;;  %319 = vmatpush.msrb.mxu0 %v2008_v18 }
  0x23   :  { %387 = vmatpush.msrb.mxu3 %v1990_v10  ;;  %543 = vmatpush.msra.mxu2 %v1966_v1 }
  0x24   :  { %341 = vmatpush.msrb.mxu1 %v2010_v19  ;;  %498 = vmatpush.msra.mxu0 %v1980_v7 }
  0x25   :  { %544 = vmatpush.msra.mxu2 %v1970_v3  ;;  %566 = vmatpush.msra.mxu3 %v1968_v2 }
  0x26   :  { %499 = vmatpush.msra.mxu0 %v1992_v11  ;;  %520 = vmatpush.msra.mxu1 %v1982_v8 }
  0x27   :  { %545 = vmatpush.msra.mxu2 %v1976_v5  ;;  %567 = vmatpush.msra.mxu3 %v1974_v4 }
  0x28   :  { %500 = vmatpush.msra.mxu0 %v2000_v15  ;;  %521 = vmatpush.msra.mxu1 %v1994_v12 }
  0x29   :  { %546 = vmatpush.msra.mxu2 %v1986_v9  ;;  %568 = vmatpush.msra.mxu3 %v1978_v6 }
  0x2a   :  { %501 = vmatpush.msra.mxu0 %v2008_v18  ;;  %522 = vmatpush.msra.mxu1 %v2002_v16 }
  0x2b   :  { %569 = vmatpush.msra.mxu3 %v1990_v10 }
  0x2c   :  { %523 = vmatpush.msra.mxu1 %v2010_v19  ;;  %1614 = vmatmul.msk.f32.vlgmr.msrb.gmra.mxu3 %vm103_vm1, %v301_v39 }
  0x2d   :  { %748 = vmatpush.msrb.mxu3 %v1968_v2 }
  0x2f   :  { %749 = vmatpush.msrb.mxu3 %v1974_v4 }
  0x31   :  { %750 = vmatpush.msrb.mxu3 %v1978_v6 }
  0x33   :  { %751 = vmatpush.msrb.mxu3 %v1990_v10 }
  0x8c   :  { %v249_v22 = vpop.permute.xlu1 %248 }
  0x98   :  { %v124_v23 = vpop.f32.mrf.mxu0  ;;  %v147_v24 = vpop.f32.mrf.mxu1 }
  0x9a   :  { %v170_v27 = vpop.f32.mrf.mxu2 }
  0x9b   :  { %v193_v28 = vpop.f32.mrf.mxu3  ;;  %v171_v29 = vadd.f32 %v170_v27, %v124_v23 }
  0x9c   :  { %v194_v30 = vadd.f32 %v193_v28, %v147_v24  ;;  %v251_v28 = vpop.permute.xlu1 %250 }
  0x9d   :  { %v202_v31 = vadd.f32 %v2055_v25, %v171_v29 }
  0x9e   :  { %v203_v32 = vadd.f32 %v2060_v26, %v194_v30 }
  0x9f   :  { %v1609_v33 = vmul.f32 -1.442695, %v202_v31 }
  0xa0   :  { %v1610_v34 = vmul.f32 -1.442695, %v203_v32 }
  0xa1   :  { %1666 = vpow2.f32 %v1609_v33 }
  0xa2   :  { %1668 = vpow2.f32 %v1610_v34  ;;  %v300_v34 = vld [vmem:[#allocation4 + $0x4] sm:$0x3] }
  0xa3   :  { %1613 = vmatmul.msk.f32.vlgmr.msrb.gmra.mxu2 %vm103_vm1, %v300_v34 }
  0xa4   :  { %725 = vmatpush.msrb.mxu2 %v1966_v1 }
  0xa6   :  { %726 = vmatpush.msrb.mxu2 %v1970_v3 }
  0xa7   :  { %v1667_v35 = vpop.eup %1666 }
  0xa8   :  { %v1669_v36 = vpop.eup %1668  ;;  %v212_v37 = vadd.f32 1.0, %v1667_v35  ;;  %727 = vmatpush.msrb.mxu2 %v1976_v5 }
  0xa9   :  { %v213_v38 = vadd.f32 1.0, %v1669_v36 }
  0xaa   :  { %1670 = vrcp.f32 %v212_v37  ;;  %v225_v46 = vand.u32 2147483648, %v212_v37  ;;  %v223_v49 = vand.u32 2147483647, %v212_v37  ;;  %vm219_vm6 = vweird.f32 %v212_v37  ;;  %728 = vmatpush.msrb.mxu2 %v1986_v9 }
  0xab   :  { %1672 = vrcp.f32 %v213_v38  ;;  %vm234_vm8 = vweird.f32 %v213_v38  ;;  %v240_v58 = vand.u32 2147483648, %v213_v38  ;;  %v238_v60 = vand.u32 2147483647, %v213_v38 }
  0xac   :  { %1674 = vtanh.f32 %v202_v31  ;;  %v226_v53 = vor.u32 1.1754944e-38, %v225_v46  ;;  %vm224_vm9 = vcmp.eq.f32.partialorder %v223_v49, 8.507059e+37 }
  0xad   :  { %1676 = vtanh.f32 %v203_v32  ;;  %v241_v62 = vor.u32 1.1754944e-38, %v240_v58  ;;  %vm239_vm12 = vcmp.eq.f32.partialorder %v238_v60, 8.507059e+37 }
  0xb0   :  { %v1671_v41 = vpop.eup %1670 }
  0xb1   :  { %v1673_v42 = vpop.eup %1672  ;;  %v215_v43 = vmul.f32 %v1671_v41, %v212_v37  ;;  %vm220_vm4 = vweird.f32 %v1671_v41 }
  0xb2   :  { %v230_v44 = vmul.f32 %v1673_v42, %v213_v38  ;;  %vm221_vm7 = vmor %vm219_vm6, %vm220_vm4  ;;  %vm235_vm10 = vweird.f32 %v1673_v42  ;;  %v1675_v56 = vpop.eup %1674 }
  0xb3   :  { %v216_v45 = vsub.f32 1.0, %v215_v43  ;;  %vm236_vm11 = vmor %vm234_vm8, %vm235_vm10  ;;  %v1677_v0 = vpop.eup %1676 }
  0xb4   :  { %v231_v47 = vsub.f32 1.0, %v230_v44 }
  0xb5   :  { %v217_v48 = vmul.f32 %v1671_v41, %v216_v45 }
  0xb6   :  { %v232_v50 = vmul.f32 %v1673_v42, %v231_v47 }
  0xb7   :  { %v218_v52 = vadd.f32 %v1671_v41, %v217_v48 }
  0xb8   :  { %v233_v55 = vadd.f32 %v1673_v42, %v232_v50 }
  0xb9   :  { %v222_v54 = vsel %vm221_vm7, %v1671_v41, %v218_v52 }
  0xba   :  { %v227_v57 = vsel %vm224_vm9, %v226_v53, %v222_v54  ;;  %v237_v61 = vsel %vm236_vm11, %v1673_v42, %v233_v55 }
  0xbb   :  { %v244_v59 = vsel %vm2064_vm5, %v1675_v56, %v227_v57  ;;  %v242_v63 = vsel %vm239_vm12, %v241_v62, %v237_v61  ;;  %v389_v57 = vpop.f32.mrf.mxu3 }
  0xbc   :  { %258 = vrot.lane.b32.xlu0 %v244_v59, %s1922_s9  ;;  %v245_v13 = vsel %vm2064_vm5, %v1677_v0, %v242_v63  ;;  %v254_v23 = vmul.f32 %v249_v22, %v244_v59 }
  0xbd   :  { %v255_v29 = vmul.f32 %v251_v28, %v245_v13 }
  0xc4   :  { %260 = vrot.lane.b32.xlu0 %v245_v13, %s1922_s9 }
 0x126   :  { %v366_v42 = vpop.f32.mrf.mxu2 }
 0x12e   :  { %v259_v14 = vpop.permute.xlu0 %258 }
 0x12f   :  { %v264_v17 = vmul.f32 %v259_v14, %v244_v59 }
 0x131   :  { %268 = vrot.lane.b32.xlu2 %v264_v17, %s1918_s27 }
 0x136   :  { %v261_v20 = vpop.permute.xlu0 %260 }
 0x137   :  { %v265_v21 = vmul.f32 %v261_v20, %v245_v13 }
 0x139   :  { %270 = vrot.lane.b32.xlu2 %v265_v21, %s1918_s27 }
 0x18b   :  { %v269_v24 = vpop.permute.xlu2 %268 }
 0x18c   :  { %v2076_v27 = vadd.f32 %v269_v24, %v254_v23 }
 0x18e   :  { %1678 = vtanh.f32 %v2076_v27 }
 0x193   :  { %v271_v30 = vpop.permute.xlu2 %270 }
 0x194   :  { %v1679_v31 = vpop.eup %1678  ;;  %v2079_v32 = vadd.f32 %v271_v30, %v255_v29 }
 0x195   :  { %280 = vrot.lane.b32.xlu0 %v1679_v31, %s1922_s9 }
 0x196   :  { %1680 = vtanh.f32 %v2079_v32 }
 0x19c   :  { %v1681_v33 = vpop.eup %1680 }
 0x19d   :  { %282 = vrot.lane.b32.xlu1 %v1681_v33, %s1922_s9 }
 0x207   :  { %v281_v35 = vpop.permute.xlu0 %280 }
 0x208   :  { %v286_v36 = vmul.f32 %v281_v35, %v244_v59 }
 0x20a   :  { %290 = vrot.lane.b32.xlu2 %v286_v36, %s1918_s27 }
 0x20f   :  { %v283_v37 = vpop.permute.xlu1 %282 }
 0x210   :  { %v287_v38 = vmul.f32 %v283_v37, %v245_v13 }
 0x212   :  { %292 = vrot.lane.b32.xlu0 %v287_v38, %s1918_s27 }
 0x264   :  { %v291_v40 = vpop.permute.xlu2 %290 }
 0x265   :  { %297 = vst.msk [vmem:[#allocation10] sm:$0x3] %vm69_vm0, %v291_v40  ;;  %1611 = vmatmul.msk.f32.vlgmr.msrb.gmra.mxu0 %vm103_vm1, %v291_v40 }
 0x266   :  { %680 = vmatpush.msrb.mxu0 %v1980_v7 }
 0x268   :  { %681 = vmatpush.msrb.mxu0 %v1992_v11 }
 0x26a   :  { %682 = vmatpush.msrb.mxu0 %v2000_v15 }
 0x26c   :  { %683 = vmatpush.msrb.mxu0 %v2008_v18 }
 0x284   :  { %v293_v41 = vpop.permute.xlu0 %292 }
 0x285   :  { %298 = vst.msk [vmem:[#allocation10 + $0x2] sm:$0x3] %vm69_vm0, %v293_v41  ;;  %1612 = vmatmul.msk.f32.vlgmr.msrb.gmra.mxu1 %vm103_vm1, %v293_v41 }
 0x286   :  { %702 = vmatpush.msrb.mxu1 %v1982_v8 }
 0x288   :  { %703 = vmatpush.msrb.mxu1 %v1994_v12 }
 0x28a   :  { %704 = vmatpush.msrb.mxu1 %v2002_v16 }
 0x28c   :  { %705 = vmatpush.msrb.mxu1 %v2010_v19 }
 0x2e2   :  { %v321_v43 = vpop.f32.mrf.mxu0 }
 0x2e3   :  { %v367_v44 = vadd.f32 %v366_v42, %v321_v43 }
 0x2e5   :  { %v392_v45 = vadd.f32 %v2055_v25, %v367_v44 }
 0x2e7   :  { %v1615_v46 = vmul.f32 -1.442695, %v392_v45 }
 0x2e9   :  { %1682 = vpow2.f32 %v1615_v46 }
 0x2ef   :  { %v1683_v47 = vpop.eup %1682 }
 0x2f0   :  { %v402_v48 = vadd.f32 1.0, %v1683_v47 }
 0x2f2   :  { %1684 = vrcp.f32 %v402_v48  ;;  %v415_v53 = vand.u32 2147483648, %v402_v48  ;;  %v413_v55 = vand.u32 2147483647, %v402_v48  ;;  %vm409_vm14 = vweird.f32 %v402_v48 }
 0x2f3   :  { %1686 = vtanh.f32 %v392_v45 }
 0x2f4   :  { %v416_v58 = vor.u32 1.1754944e-38, %v415_v53  ;;  %vm414_vm2 = vcmp.eq.f32.partialorder %v413_v55, 8.507059e+37  ;;  %v483_v53 = vld [vmem:[#allocation4 + $0xa] sm:$0x3] }
 0x2f5   :  { %1620 = vmatmul.msk.f32.vlgmr.msra.gmra.mxu3 %vm103_vm1, %v483_v53 }
 0x2f6   :  { %930 = vmatpush.msra.mxu3 %v1968_v2 }
 0x2f8   :  { %v1685_v49 = vpop.eup %1684  ;;  %931 = vmatpush.msra.mxu3 %v1974_v4 }
 0x2f9   :  { %v405_v50 = vmul.f32 %v1685_v49, %v402_v48  ;;  %vm410_vm13 = vweird.f32 %v1685_v49  ;;  %v1687_v60 = vpop.eup %1686 }
 0x2fa   :  { %vm411_vm15 = vmor %vm409_vm14, %vm410_vm13  ;;  %932 = vmatpush.msra.mxu3 %v1978_v6 }
 0x2fb   :  { %v406_v52 = vsub.f32 1.0, %v405_v50  ;;  %v482_v50 = vld [vmem:[#allocation4 + $0x8] sm:$0x3] }
 0x2fc   :  { %1619 = vmatmul.msk.f32.vlgmr.msra.gmra.mxu2 %vm103_vm1, %v482_v50  ;;  %933 = vmatpush.msra.mxu3 %v1990_v10 }
 0x2fd   :  { %v407_v54 = vmul.f32 %v1685_v49, %v406_v52  ;;  %907 = vmatpush.msra.mxu2 %v1966_v1 }
 0x2ff   :  { %v408_v56 = vadd.f32 %v1685_v49, %v407_v54  ;;  %908 = vmatpush.msra.mxu2 %v1970_v3 }
 0x301   :  { %v412_v59 = vsel %vm411_vm15, %v1685_v49, %v408_v56  ;;  %909 = vmatpush.msra.mxu2 %v1976_v5 }
 0x302   :  { %v343_v61 = vpop.f32.mrf.mxu1  ;;  %v417_v62 = vsel %vm414_vm2, %v416_v58, %v412_v59 }
 0x303   :  { %v390_v63 = vadd.f32 %v389_v57, %v343_v61  ;;  %v434_v0 = vsel %vm2064_vm5, %v1687_v60, %v417_v62  ;;  %910 = vmatpush.msra.mxu2 %v1986_v9 }
 0x304   :  { %440 = vrot.lane.b32.xlu1 %v434_v0, %s1922_s9  ;;  %v436_v41 = vmul.f32 %v434_v0, %v2076_v27 }
 0x305   :  { %v393_v13 = vadd.f32 %v2060_v26, %v390_v63 }
 0x307   :  { %v1616_v14 = vmul.f32 -1.442695, %v393_v13 }
 0x309   :  { %1688 = vpow2.f32 %v1616_v14 }
 0x30f   :  { %v1689_v17 = vpop.eup %1688 }
 0x310   :  { %v403_v20 = vadd.f32 1.0, %v1689_v17 }
 0x312   :  { %1690 = vrcp.f32 %v403_v20  ;;  %v430_v24 = vand.u32 2147483648, %v403_v20  ;;  %v428_v29 = vand.u32 2147483647, %v403_v20  ;;  %vm424_vm4 = vweird.f32 %v403_v20 }
 0x313   :  { %1692 = vtanh.f32 %v393_v13 }
 0x314   :  { %v431_v31 = vor.u32 1.1754944e-38, %v430_v24  ;;  %vm429_vm7 = vcmp.eq.f32.partialorder %v428_v29, 8.507059e+37 }
 0x318   :  { %v1691_v21 = vpop.eup %1690 }
 0x319   :  { %v420_v22 = vmul.f32 %v1691_v21, %v403_v20  ;;  %vm425_vm3 = vweird.f32 %v1691_v21  ;;  %v1693_v34 = vpop.eup %1692 }
 0x31a   :  { %vm426_vm6 = vmor %vm424_vm4, %vm425_vm3 }
 0x31b   :  { %v421_v23 = vsub.f32 1.0, %v420_v22 }
 0x31d   :  { %v422_v28 = vmul.f32 %v1691_v21, %v421_v23 }
 0x31f   :  { %v423_v30 = vadd.f32 %v1691_v21, %v422_v28 }
 0x321   :  { %v427_v33 = vsel %vm426_vm6, %v1691_v21, %v423_v30 }
 0x322   :  { %v432_v35 = vsel %vm429_vm7, %v431_v31, %v427_v33 }
 0x323   :  { %v435_v36 = vsel %vm2064_vm5, %v1693_v34, %v432_v35 }
 0x324   :  { %442 = vrot.lane.b32.xlu2 %v435_v36, %s1922_s9  ;;  %v437_v44 = vmul.f32 %v435_v36, %v2079_v32 }
 0x376   :  { %v441_v37 = vpop.permute.xlu1 %440 }
 0x377   :  { %v446_v38 = vmul.f32 %v441_v37, %v434_v0 }
 0x378   :  { %v571_v61 = vpop.f32.mrf.mxu3 }
 0x379   :  { %450 = vrot.lane.b32.xlu0 %v446_v38, %s1918_s27 }
 0x37e   :  { %v443_v39 = vpop.permute.xlu2 %442 }
 0x37f   :  { %v447_v40 = vmul.f32 %v443_v39, %v435_v36  ;;  %v548_v56 = vpop.f32.mrf.mxu2 }
 0x381   :  { %452 = vrot.lane.b32.xlu1 %v447_v40, %s1918_s27 }
 0x3eb   :  { %v451_v42 = vpop.permute.xlu0 %450 }
 0x3ec   :  { %v2119_v43 = vadd.f32 %v451_v42, %v436_v41 }
 0x3ee   :  { %1694 = vtanh.f32 %v2119_v43 }
 0x3f3   :  { %v453_v45 = vpop.permute.xlu1 %452 }
 0x3f4   :  { %v1695_v46 = vpop.eup %1694  ;;  %v2123_v47 = vadd.f32 %v453_v45, %v437_v44 }
 0x3f5   :  { %462 = vrot.lane.b32.xlu2 %v1695_v46, %s1922_s9 }
 0x3f6   :  { %1696 = vtanh.f32 %v2123_v47 }
 0x3fc   :  { %v1697_v48 = vpop.eup %1696 }
 0x3fd   :  { %464 = vrot.lane.b32.xlu0 %v1697_v48, %s1922_s9 }
 0x44f   :  { %v463_v49 = vpop.permute.xlu2 %462 }
 0x450   :  { %v468_v27 = vmul.f32 %v463_v49, %v434_v0 }
 0x452   :  { %472 = vrot.lane.b32.xlu1 %v468_v27, %s1918_s27 }
 0x46f   :  { %v465_v32 = vpop.permute.xlu0 %464 }
 0x470   :  { %v469_v52 = vmul.f32 %v465_v32, %v435_v36 }
 0x472   :  { %474 = vrot.lane.b32.xlu2 %v469_v52, %s1918_s27 }
 0x4c4   :  { %v473_v54 = vpop.permute.xlu1 %472 }
 0x4c5   :  { %479 = vst.msk [vmem:[#allocation10 + $0x4] sm:$0x3] %vm69_vm0, %v473_v54  ;;  %1617 = vmatmul.msk.f32.vlgmr.msra.gmra.mxu0 %vm103_vm1, %v473_v54 }
 0x4c6   :  { %862 = vmatpush.msra.mxu0 %v1980_v7 }
 0x4c8   :  { %863 = vmatpush.msra.mxu0 %v1992_v11 }
 0x4ca   :  { %864 = vmatpush.msra.mxu0 %v2000_v15 }
 0x4cc   :  { %v475_v55 = vpop.permute.xlu2 %474  ;;  %865 = vmatpush.msra.mxu0 %v2008_v18 }
 0x4cd   :  { %480 = vst.msk [vmem:[#allocation10 + $0x6] sm:$0x3] %vm69_vm0, %v475_v55  ;;  %1618 = vmatmul.msk.f32.vlgmr.msra.gmra.mxu1 %vm103_vm1, %v475_v55 }
 0x4ce   :  { %884 = vmatpush.msra.mxu1 %v1982_v8 }
 0x4d0   :  { %885 = vmatpush.msra.mxu1 %v1994_v12 }
 0x4d2   :  { %886 = vmatpush.msra.mxu1 %v2002_v16 }
 0x4d4   :  { %887 = vmatpush.msra.mxu1 %v2010_v19 }
 0x542   :  { %v503_v57 = vpop.f32.mrf.mxu0 }
 0x543   :  { %v549_v58 = vadd.f32 %v548_v56, %v503_v57 }
 0x545   :  { %v574_v59 = vadd.f32 %v2055_v25, %v549_v58 }
 0x547   :  { %v1621_v60 = vmul.f32 -1.442695, %v574_v59 }
 0x549   :  { %1698 = vpow2.f32 %v1621_v60 }
 0x54a   :  { %v525_v62 = vpop.f32.mrf.mxu1 }
 0x54b   :  { %v572_v63 = vadd.f32 %v571_v61, %v525_v62 }
 0x54d   :  { %v575_v0 = vadd.f32 %v2060_v26, %v572_v63  ;;  %v664_v63 = vld [vmem:[#allocation4 + $0xc] sm:$0x3] }
 0x54e   :  { %1625 = vmatmul.msk.f32.vlgmr.msrb.gmra.mxu2 %vm103_vm1, %v664_v63 }
 0x54f   :  { %v1699_v13 = vpop.eup %1698  ;;  %v1622_v14 = vmul.f32 -1.442695, %v575_v0  ;;  %1089 = vmatpush.msrb.mxu2 %v1966_v1 }
 0x550   :  { %v584_v17 = vadd.f32 1.0, %v1699_v13 }
 0x551   :  { %1700 = vpow2.f32 %v1622_v14  ;;  %1090 = vmatpush.msrb.mxu2 %v1970_v3  ;;  %v665_v14 = vld [vmem:[#allocation4 + $0xe] sm:$0x3] }
 0x552   :  { %1702 = vrcp.f32 %v584_v17  ;;  %v597_v28 = vand.u32 2147483648, %v584_v17  ;;  %v595_v30 = vand.u32 2147483647, %v584_v17  ;;  %vm591_vm9 = vweird.f32 %v584_v17  ;;  %1626 = vmatmul.msk.f32.vlgmr.msrb.gmra.mxu3 %vm103_vm1, %v665_v14 }
 0x553   :  { %1091 = vmatpush.msrb.mxu2 %v1976_v5  ;;  %1112 = vmatpush.msrb.mxu3 %v1968_v2 }
 0x554   :  { %v598_v34 = vor.u32 1.1754944e-38, %v597_v28  ;;  %vm596_vm11 = vcmp.eq.f32.partialorder %v595_v30, 8.507059e+37 }
 0x555   :  { %1092 = vmatpush.msrb.mxu2 %v1986_v9  ;;  %1113 = vmatpush.msrb.mxu3 %v1974_v4 }
 0x557   :  { %v1701_v20 = vpop.eup %1700  ;;  %1114 = vmatpush.msrb.mxu3 %v1978_v6 }
 0x558   :  { %v1703_v21 = vpop.eup %1702  ;;  %v585_v22 = vadd.f32 1.0, %v1701_v20 }
 0x559   :  { %v587_v23 = vmul.f32 %v1703_v21, %v584_v17  ;;  %vm592_vm8 = vweird.f32 %v1703_v21  ;;  %1115 = vmatpush.msrb.mxu3 %v1990_v10 }
 0x55a   :  { %1704 = vrcp.f32 %v585_v22  ;;  %vm593_vm10 = vmor %vm591_vm9, %vm592_vm8  ;;  %v612_v41 = vand.u32 2147483648, %v585_v22  ;;  %v610_v44 = vand.u32 2147483647, %v585_v22  ;;  %vm606_vm13 = vweird.f32 %v585_v22 }
 0x55b   :  { %v588_v24 = vsub.f32 1.0, %v587_v23  ;;  %1706 = vtanh.f32 %v574_v59 }
 0x55c   :  { %1708 = vtanh.f32 %v575_v0  ;;  %v613_v46 = vor.u32 1.1754944e-38, %v612_v41  ;;  %vm611_vm15 = vcmp.eq.f32.partialorder %v610_v44, 8.507059e+37 }
 0x55d   :  { %v589_v29 = vmul.f32 %v1703_v21, %v588_v24 }
 0x55f   :  { %v590_v31 = vadd.f32 %v1703_v21, %v589_v29 }
 0x560   :  { %v1705_v33 = vpop.eup %1704 }
 0x561   :  { %v594_v35 = vsel %vm593_vm10, %v1703_v21, %v590_v31  ;;  %v602_v36 = vmul.f32 %v1705_v33, %v585_v22  ;;  %v1707_v37 = vpop.eup %1706  ;;  %vm607_vm12 = vweird.f32 %v1705_v33 }
 0x562   :  { %v599_v38 = vsel %vm596_vm11, %v598_v34, %v594_v35  ;;  %vm608_vm14 = vmor %vm606_vm13, %vm607_vm12  ;;  %v1709_v49 = vpop.eup %1708 }
 0x563   :  { %v616_v39 = vsel %vm2064_vm5, %v1707_v37, %v599_v38  ;;  %v603_v40 = vsub.f32 1.0, %v602_v36 }
 0x564   :  { %622 = vrot.lane.b32.xlu0 %v616_v39, %s1922_s9  ;;  %v618_v55 = vmul.f32 %v616_v39, %v2119_v43 }
 0x565   :  { %v604_v42 = vmul.f32 %v1705_v33, %v603_v40 }
 0x567   :  { %v605_v45 = vadd.f32 %v1705_v33, %v604_v42 }
 0x569   :  { %v609_v48 = vsel %vm608_vm14, %v1705_v33, %v605_v45 }
 0x56a   :  { %v614_v27 = vsel %vm611_vm15, %v613_v46, %v609_v48 }
 0x56b   :  { %v617_v50 = vsel %vm2064_vm5, %v1709_v49, %v614_v27 }
 0x56c   :  { %624 = vrot.lane.b32.xlu1 %v617_v50, %s1922_s9  ;;  %v619_v59 = vmul.f32 %v617_v50, %v2123_v47 }
 0x5d1   :  { %v730_v21 = vpop.f32.mrf.mxu2 }
 0x5d5   :  { %v753_v29 = vpop.f32.mrf.mxu3 }
 0x5d6   :  { %v623_v32 = vpop.permute.xlu0 %622 }
 0x5d7   :  { %v628_v52 = vmul.f32 %v623_v32, %v616_v39 }
 0x5d9   :  { %632 = vrot.lane.b32.xlu2 %v628_v52, %s1918_s27 }
 0x5de   :  { %v625_v53 = vpop.permute.xlu1 %624 }
 0x5df   :  { %v629_v54 = vmul.f32 %v625_v53, %v617_v50 }
 0x5e1   :  { %634 = vrot.lane.b32.xlu0 %v629_v54, %s1918_s27 }
 0x633   :  { %v633_v56 = vpop.permute.xlu2 %632 }
 0x634   :  { %v2163_v57 = vadd.f32 %v633_v56, %v618_v55 }
 0x636   :  { %1710 = vtanh.f32 %v2163_v57 }
 0x63c   :  { %v1711_v58 = vpop.eup %1710 }
 0x63d   :  { %644 = vrot.lane.b32.xlu1 %v1711_v58, %s1922_s9 }
 0x653   :  { %v635_v60 = vpop.permute.xlu0 %634 }
 0x654   :  { %v2168_v61 = vadd.f32 %v635_v60, %v619_v59 }
 0x656   :  { %1712 = vtanh.f32 %v2168_v61 }
 0x65c   :  { %v1713_v62 = vpop.eup %1712 }
 0x65d   :  { %646 = vrot.lane.b32.xlu2 %v1713_v62, %s1922_s9 }
 0x6af   :  { %v645_v43 = vpop.permute.xlu1 %644 }
 0x6b0   :  { %v650_v47 = vmul.f32 %v645_v43, %v616_v39 }
 0x6b2   :  { %654 = vrot.lane.b32.xlu0 %v650_v47, %s1918_s27 }
 0x6b7   :  { %v647_v0 = vpop.permute.xlu2 %646 }
 0x6b8   :  { %v651_v13 = vmul.f32 %v647_v0, %v617_v50 }
 0x6ba   :  { %656 = vrot.lane.b32.xlu1 %v651_v13, %s1918_s27 }
 0x724   :  { %v655_v17 = vpop.permute.xlu0 %654 }
 0x725   :  { %661 = vst.msk [vmem:[#allocation10 + $0x8] sm:$0x3] %vm69_vm0, %v655_v17  ;;  %1623 = vmatmul.msk.f32.vlgmr.msrb.gmra.mxu0 %vm103_vm1, %v655_v17 }
 0x726   :  { %1044 = vmatpush.msrb.mxu0 %v1980_v7 }
 0x728   :  { %1045 = vmatpush.msrb.mxu0 %v1992_v11 }
 0x72a   :  { %1046 = vmatpush.msrb.mxu0 %v2000_v15 }
 0x72c   :  { %v657_v20 = vpop.permute.xlu1 %656  ;;  %1047 = vmatpush.msrb.mxu0 %v2008_v18 }
 0x72d   :  { %662 = vst.msk [vmem:[#allocation10 + $0xa] sm:$0x3] %vm69_vm0, %v657_v20  ;;  %1624 = vmatmul.msk.f32.vlgmr.msrb.gmra.mxu1 %vm103_vm1, %v657_v20 }
 0x72e   :  { %1066 = vmatpush.msrb.mxu1 %v1982_v8 }
 0x730   :  { %1067 = vmatpush.msrb.mxu1 %v1994_v12 }
 0x732   :  { %1068 = vmatpush.msrb.mxu1 %v2002_v16 }
 0x734   :  { %1069 = vmatpush.msrb.mxu1 %v2010_v19 }
 0x7a2   :  { %v685_v22 = vpop.f32.mrf.mxu0 }
 0x7a3   :  { %v731_v23 = vadd.f32 %v730_v21, %v685_v22 }
 0x7a5   :  { %v756_v24 = vadd.f32 %v2055_v25, %v731_v23 }
 0x7a7   :  { %v1627_v28 = vmul.f32 -1.442695, %v756_v24 }
 0x7a9   :  { %1714 = vpow2.f32 %v1627_v28 }
 0x7aa   :  { %v707_v30 = vpop.f32.mrf.mxu1 }
 0x7ab   :  { %v754_v31 = vadd.f32 %v753_v29, %v707_v30 }
 0x7ad   :  { %v757_v33 = vadd.f32 %v2060_v26, %v754_v31  ;;  %v846_v31 = vld [vmem:[#allocation4 + $0x10] sm:$0x3] }
 0x7ae   :  { %1631 = vmatmul.msk.f32.vlgmr.msra.gmra.mxu2 %vm103_vm1, %v846_v31  ;;  %v1796_v31 = vld [vmem:[#allocation7 + $0x8] sm:$0xff] }
 0x7af   :  { %v1715_v34 = vpop.eup %1714  ;;  %v1628_v35 = vmul.f32 -1.442695, %v757_v33  ;;  %1271 = vmatpush.msra.mxu2 %v1966_v1 }
 0x7b0   :  { %v766_v36 = vadd.f32 1.0, %v1715_v34 }
 0x7b1   :  { %1716 = vpow2.f32 %v1628_v35  ;;  %1272 = vmatpush.msra.mxu2 %v1970_v3  ;;  %v847_v35 = vld [vmem:[#allocation4 + $0x12] sm:$0x3] }
 0x7b2   :  { %1718 = vrcp.f32 %v766_v36  ;;  %v779_v42 = vand.u32 2147483648, %v766_v36  ;;  %v777_v45 = vand.u32 2147483647, %v766_v36  ;;  %vm773_vm3 = vweird.f32 %v766_v36  ;;  %1632 = vmatmul.msk.f32.vlgmr.msra.gmra.mxu3 %vm103_vm1, %v847_v35  ;;  %v1798_v35 = vld [vmem:[#allocation7 + $0x38] sm:$0xff] }
 0x7b3   :  { %1273 = vmatpush.msra.mxu2 %v1976_v5  ;;  %1294 = vmatpush.msra.mxu3 %v1968_v2 }
 0x7b4   :  { %v780_v49 = vor.u32 1.1754944e-38, %v779_v42  ;;  %vm778_vm6 = vcmp.eq.f32.partialorder %v777_v45, 8.507059e+37 }
 0x7b5   :  { %1274 = vmatpush.msra.mxu2 %v1986_v9  ;;  %1295 = vmatpush.msra.mxu3 %v1974_v4 }
 0x7b7   :  { %v1717_v37 = vpop.eup %1716  ;;  %1296 = vmatpush.msra.mxu3 %v1978_v6 }
 0x7b8   :  { %v1719_v38 = vpop.eup %1718  ;;  %v767_v39 = vadd.f32 1.0, %v1717_v37 }
 0x7b9   :  { %v769_v40 = vmul.f32 %v1719_v38, %v766_v36  ;;  %vm774_vm2 = vweird.f32 %v1719_v38  ;;  %1297 = vmatpush.msra.mxu3 %v1990_v10 }
 0x7ba   :  { %1720 = vrcp.f32 %v767_v39  ;;  %vm775_vm4 = vmor %vm773_vm3, %vm774_vm2  ;;  %v794_v55 = vand.u32 2147483648, %v767_v39  ;;  %v792_v58 = vand.u32 2147483647, %v767_v39  ;;  %vm788_vm8 = vweird.f32 %v767_v39 }
 0x7bb   :  { %v770_v41 = vsub.f32 1.0, %v769_v40  ;;  %1722 = vtanh.f32 %v756_v24 }
 0x7bc   :  { %1724 = vtanh.f32 %v757_v33  ;;  %v795_v60 = vor.u32 1.1754944e-38, %v794_v55  ;;  %vm793_vm10 = vcmp.eq.f32.partialorder %v792_v58, 8.507059e+37 }
 0x7bd   :  { %v771_v44 = vmul.f32 %v1719_v38, %v770_v41 }
 0x7bf   :  { %v772_v46 = vadd.f32 %v1719_v38, %v771_v44 }
 0x7c0   :  { %v1721_v48 = vpop.eup %1720 }
 0x7c1   :  { %v776_v27 = vsel %vm775_vm4, %v1719_v38, %v772_v46  ;;  %v784_v50 = vmul.f32 %v1721_v48, %v767_v39  ;;  %v1723_v32 = vpop.eup %1722  ;;  %vm789_vm7 = vweird.f32 %v1721_v48 }
 0x7c2   :  { %v781_v52 = vsel %vm778_vm6, %v780_v49, %v776_v27  ;;  %vm790_vm9 = vmor %vm788_vm8, %vm789_vm7  ;;  %v1725_v63 = vpop.eup %1724 }
 0x7c3   :  { %v798_v53 = vsel %vm2064_vm5, %v1723_v32, %v781_v52  ;;  %v785_v54 = vsub.f32 1.0, %v784_v50 }
 0x7c4   :  { %804 = vrot.lane.b32.xlu2 %v798_v53, %s1922_s9  ;;  %v800_v20 = vmul.f32 %v798_v53, %v2163_v57 }
 0x7c5   :  { %v786_v56 = vmul.f32 %v1721_v48, %v785_v54 }
 0x7c7   :  { %v787_v59 = vadd.f32 %v1721_v48, %v786_v56 }
 0x7c9   :  { %v791_v62 = vsel %vm790_vm9, %v1721_v48, %v787_v59 }
 0x7ca   :  { %v796_v43 = vsel %vm793_vm10, %v795_v60, %v791_v62 }
 0x7cb   :  { %v799_v47 = vsel %vm2064_vm5, %v1725_v63, %v796_v43 }
 0x7cc   :  { %806 = vrot.lane.b32.xlu0 %v799_v47, %s1922_s9  ;;  %v801_v23 = vmul.f32 %v799_v47, %v2168_v61 }
 0x81e   :  { %v805_v0 = vpop.permute.xlu2 %804 }
 0x81f   :  { %v810_v13 = vmul.f32 %v805_v0, %v798_v53 }
 0x821   :  { %814 = vrot.lane.b32.xlu1 %v810_v13, %s1918_s27 }
 0x831   :  { %v912_v3 = vpop.f32.mrf.mxu2 }
 0x83e   :  { %v807_v14 = vpop.permute.xlu0 %806 }
 0x83f   :  { %v811_v17 = vmul.f32 %v807_v14, %v799_v47 }
 0x841   :  { %816 = vrot.lane.b32.xlu2 %v811_v17, %s1918_s27 }
 0x893   :  { %v815_v21 = vpop.permute.xlu1 %814 }
 0x894   :  { %v2207_v22 = vadd.f32 %v815_v21, %v800_v20 }
 0x896   :  { %1726 = vtanh.f32 %v2207_v22 }
 0x89b   :  { %v817_v24 = vpop.permute.xlu2 %816 }
 0x89c   :  { %v1727_v28 = vpop.eup %1726  ;;  %v2211_v29 = vadd.f32 %v817_v24, %v801_v23 }
 0x89d   :  { %826 = vrot.lane.b32.xlu0 %v1727_v28, %s1922_s9  ;;  %v1028_v28 = vld [vmem:[#allocation4 + $0x14] sm:$0x3] }
 0x89e   :  { %1728 = vtanh.f32 %v2211_v29  ;;  %1637 = vmatmul.msk.f32.vlgmr.msrb.gmra.mxu2 %vm103_vm1, %v1028_v28 }
 0x8a4   :  { %v1729_v30 = vpop.eup %1728 }
 0x8a5   :  { %828 = vrot.lane.b32.xlu1 %v1729_v30, %s1922_s9  ;;  %v1794_v30 = vld [vmem:[#allocation7 + $0x18] sm:$0xff] }
 0x8a6   :  { %1453 = vmatpush.msrb.mxu2 %v1794_v30 }
 0x90f   :  { %v827_v57 = vpop.permute.xlu0 %826 }
 0x910   :  { %v832_v61 = vmul.f32 %v827_v57, %v798_v53  ;;  %v1797_v57 = vld [vmem:[#allocation7] sm:$0xff] }
 0x912   :  { %836 = vrot.lane.b32.xlu2 %v832_v61, %s1918_s27 }
 0x917   :  { %v829_v33 = vpop.permute.xlu1 %828 }
 0x918   :  { %v833_v34 = vmul.f32 %v829_v33, %v799_v47 }
 0x91a   :  { %838 = vrot.lane.b32.xlu0 %v833_v34, %s1918_s27  ;;  %v1029_v34 = vld [vmem:[#allocation4 + $0x16] sm:$0x3] }
 0x91b   :  { %1638 = vmatmul.msk.f32.vlgmr.msrb.gmra.mxu3 %vm103_vm1, %v1029_v34 }
 0x91c   :  { %1476 = vmatpush.msrb.mxu3 %v1798_v35 }
 0x96c   :  { %v837_v1 = vpop.permute.xlu2 %836 }
 0x96d   :  { %843 = vst.msk [vmem:[#allocation10 + $0xc] sm:$0x3] %vm69_vm0, %v837_v1  ;;  %1629 = vmatmul.msk.f32.vlgmr.msra.gmra.mxu0 %vm103_vm1, %v837_v1  ;;  %v1799_v1 = vld [vmem:[#allocation7 + $0x30] sm:$0xff] }
 0x96e   :  { %1226 = vmatpush.msra.mxu0 %v1980_v7  ;;  %1477 = vmatpush.msrb.mxu3 %v1799_v1 }
 0x970   :  { %1227 = vmatpush.msra.mxu0 %v1992_v11 }
 0x972   :  { %1228 = vmatpush.msra.mxu0 %v2000_v15 }
 0x974   :  { %1229 = vmatpush.msra.mxu0 %v2008_v18 }
 0x98c   :  { %v839_v2 = vpop.permute.xlu0 %838 }
 0x98d   :  { %844 = vst.msk [vmem:[#allocation10 + $0xe] sm:$0x3] %vm69_vm0, %v839_v2  ;;  %1630 = vmatmul.msk.f32.vlgmr.msra.gmra.mxu1 %vm103_vm1, %v839_v2  ;;  %v1800_v2 = vld [vmem:[#allocation7 + $0x28] sm:$0xff] }
 0x98e   :  { %1248 = vmatpush.msra.mxu1 %v1982_v8  ;;  %1478 = vmatpush.msrb.mxu3 %v1800_v2 }
 0x990   :  { %1249 = vmatpush.msra.mxu1 %v1994_v12 }
 0x992   :  { %1250 = vmatpush.msra.mxu1 %v2002_v16 }
 0x994   :  { %1251 = vmatpush.msra.mxu1 %v2010_v19  ;;  %v935_v19 = vpop.f32.mrf.mxu3 }
 0x9ea   :  { %v867_v4 = vpop.f32.mrf.mxu0 }
 0x9eb   :  { %v913_v5 = vadd.f32 %v912_v3, %v867_v4  ;;  %v1801_v3 = vld [vmem:[#allocation7 + $0x20] sm:$0xff] }
 0x9ec   :  { %1479 = vmatpush.msrb.mxu3 %v1801_v3 }
 0x9ed   :  { %v938_v6 = vadd.f32 %v2055_v25, %v913_v5  ;;  %v1802_v5 = vld [vmem:[#allocation9 + $0x18] sm:$0xff] }
 0x9ef   :  { %v1633_v7 = vmul.f32 -1.442695, %v938_v6 }
 0x9f1   :  { %1730 = vpow2.f32 %v1633_v7  ;;  %v1804_v7 = vld [vmem:[#allocation9 + $0x8] sm:$0xff] }
 0x9f7   :  { %v1731_v9 = vpop.eup %1730 }
 0x9f8   :  { %v948_v10 = vadd.f32 1.0, %v1731_v9 }
 0x9fa   :  { %1732 = vrcp.f32 %v948_v10  ;;  %v961_v8 = vand.u32 2147483648, %v948_v10  ;;  %v959_v16 = vand.u32 2147483647, %v948_v10  ;;  %vm955_vm12 = vweird.f32 %v948_v10 }
 0x9fb   :  { %1734 = vtanh.f32 %v938_v6  ;;  %v1803_v6 = vld [vmem:[#allocation9 + $0x10] sm:$0xff] }
 0x9fc   :  { %v962_v37 = vor.u32 1.1754944e-38, %v961_v8  ;;  %vm960_vm14 = vcmp.eq.f32.partialorder %v959_v16, 8.507059e+37  ;;  %v1809_v8 = vld [vmem:[#allocation9 + $0x20] sm:$0xff] }
 0xa00   :  { %v1733_v11 = vpop.eup %1732 }
 0xa01   :  { %v951_v15 = vmul.f32 %v1733_v11, %v948_v10  ;;  %vm956_vm11 = vweird.f32 %v1733_v11  ;;  %v1735_v25 = vpop.eup %1734  ;;  %v1805_v10 = vld [vmem:[#allocation9] sm:$0xff] }
 0xa02   :  { %vm957_vm13 = vmor %vm955_vm12, %vm956_vm11 }
 0xa03   :  { %v952_v18 = vsub.f32 1.0, %v951_v15  ;;  %v1807_v15 = vld [vmem:[#allocation9 + $0x30] sm:$0xff] }
 0xa05   :  { %v953_v12 = vmul.f32 %v1733_v11, %v952_v18  ;;  %v1808_v18 = vld [vmem:[#allocation9 + $0x28] sm:$0xff] }
 0xa07   :  { %v954_v36 = vadd.f32 %v1733_v11, %v953_v12  ;;  %v1094_v12 = vpop.f32.mrf.mxu2 }
 0xa09   :  { %v958_v38 = vsel %vm957_vm13, %v1733_v11, %v954_v36  ;;  %v1806_v11 = vld [vmem:[#allocation9 + $0x38] sm:$0xff] }
 0xa0a   :  { %v889_v39 = vpop.f32.mrf.mxu1  ;;  %v963_v40 = vsel %vm960_vm14, %v962_v37, %v958_v38 }
 0xa0b   :  { %v936_v41 = vadd.f32 %v935_v19, %v889_v39  ;;  %v980_v42 = vsel %vm2064_vm5, %v1735_v25, %v963_v40  ;;  %v2271_v19 = vld [vmem:[%s2365_s3] ss:$0 sm:$0xff]  ;;  %v1117_v25 = vpop.f32.mrf.mxu3 }
 0xa0c   :  { %986 = vrot.lane.b32.xlu1 %v980_v42, %s1922_s9  ;;  %v982_v47 = vmul.f32 %v980_v42, %v2207_v22 }
 0xa0d   :  { %v939_v44 = vadd.f32 %v2060_v26, %v936_v41  ;;  %v2277_v41 = vld [vmem:[%s2365_s3 + $0x1] ss:$0 sm:$0xff]  ;;  %s1923_s3 = smov 96  }
 0xa0f   :  { %v1634_v45 = vmul.f32 -1.442695, %v939_v44 }
 0xa11   :  { %1736 = vpow2.f32 %v1634_v45 }
 0xa17   :  { %v1737_v46 = vpop.eup %1736 }
 0xa18   :  { %v949_v48 = vadd.f32 1.0, %v1737_v46 }
 0xa1a   :  { %1738 = vrcp.f32 %v949_v48  ;;  %v976_v32 = vand.u32 2147483648, %v949_v48  ;;  %v974_v53 = vand.u32 2147483647, %v949_v48  ;;  %vm970_vm2 = vweird.f32 %v949_v48 }
 0xa1b   :  { %1740 = vtanh.f32 %v939_v44 }
 0xa1c   :  { %v977_v55 = vor.u32 1.1754944e-38, %v976_v32  ;;  %vm975_vm4 = vcmp.eq.f32.partialorder %v974_v53, 8.507059e+37 }
 0xa20   :  { %v1739_v49 = vpop.eup %1738 }
 0xa21   :  { %v966_v27 = vmul.f32 %v1739_v49, %v949_v48  ;;  %vm971_vm15 = vweird.f32 %v1739_v49  ;;  %v1741_v26 = vpop.eup %1740 }
 0xa22   :  { %vm972_vm3 = vmor %vm970_vm2, %vm971_vm15 }
 0xa23   :  { %v967_v50 = vsub.f32 1.0, %v966_v27 }
 0xa25   :  { %v968_v52 = vmul.f32 %v1739_v49, %v967_v50 }
 0xa27   :  { %v969_v54 = vadd.f32 %v1739_v49, %v968_v52 }
 0xa29   :  { %v973_v56 = vsel %vm972_vm3, %v1739_v49, %v969_v54 }
 0xa2a   :  { %v978_v58 = vsel %vm975_vm4, %v977_v55, %v973_v56 }
 0xa2b   :  { %v981_v59 = vsel %vm2064_vm5, %v1741_v26, %v978_v58 }
 0xa2c   :  { %988 = vrot.lane.b32.xlu2 %v981_v59, %s1922_s9  ;;  %v983_v14 = vmul.f32 %v981_v59, %v2211_v29  ;;  %v1795_v29 = vld [vmem:[#allocation7 + $0x10] sm:$0xff] }
 0xa2d   :  { %1454 = vmatpush.msrb.mxu2 %v1795_v29 }
 0xa2f   :  { %1455 = vmatpush.msrb.mxu2 %v1796_v31 }
 0xa31   :  { %1456 = vmatpush.msrb.mxu2 %v1797_v57 }
 0xa7e   :  { %v987_v60 = vpop.permute.xlu1 %986 }
 0xa7f   :  { %v992_v62 = vmul.f32 %v987_v60, %v980_v42 }
 0xa81   :  { %996 = vrot.lane.b32.xlu0 %v992_v62, %s1918_s27 }
 0xa86   :  { %v989_v63 = vpop.permute.xlu2 %988 }
 0xa87   :  { %v993_v43 = vmul.f32 %v989_v63, %v981_v59 }
 0xa89   :  { %998 = vrot.lane.b32.xlu1 %v993_v43, %s1918_s27 }
 0xaf3   :  { %v997_v0 = vpop.permute.xlu0 %996 }
 0xaf4   :  { %v2251_v13 = vadd.f32 %v997_v0, %v982_v47 }
 0xaf6   :  { %1742 = vtanh.f32 %v2251_v13 }
 0xafb   :  { %v999_v17 = vpop.permute.xlu1 %998 }
 0xafc   :  { %v1743_v20 = vpop.eup %1742  ;;  %v2255_v21 = vadd.f32 %v999_v17, %v983_v14 }
 0xafd   :  { %1008 = vrot.lane.b32.xlu2 %v1743_v20, %s1922_s9 }
 0xafe   :  { %1744 = vtanh.f32 %v2255_v21 }
 0xb04   :  { %v1745_v23 = vpop.eup %1744 }
 0xb05   :  { %1010 = vrot.lane.b32.xlu0 %v1745_v23, %s1922_s9 }
 0xb57   :  { %v1009_v24 = vpop.permute.xlu2 %1008 }
 0xb58   :  { %v1014_v22 = vmul.f32 %v1009_v24, %v980_v42 }
 0xb5a   :  { %1018 = vrot.lane.b32.xlu1 %v1014_v22, %s1918_s27 }
 0xb77   :  { %v1011_v61 = vpop.permute.xlu0 %1010 }
 0xb78   :  { %v1015_v33 = vmul.f32 %v1011_v61, %v981_v59 }
 0xb7a   :  { %1020 = vrot.lane.b32.xlu2 %v1015_v33, %s1918_s27 }
 0xbcc   :  { %v1019_v4 = vpop.permute.xlu1 %1018 }
 0xbcd   :  { %1025 = vst.msk [vmem:[#allocation10 + $0x10] sm:$0x3] %vm69_vm0, %v1019_v4  ;;  %1635 = vmatmul.msk.f32.vlgmr.msrb.gmra.mxu0 %vm103_vm1, %v1019_v4 }
 0xbce   :  { %1408 = vmatpush.msrb.mxu0 %v1802_v5  ;;  %v1210_v5 = vld [vmem:[#allocation4 + $0x18] sm:$0x3] }
 0xbcf   :  { %1643 = vmatmul.msk.f32.vlgmr.msra.gmra.mxu2 %vm103_vm1, %v1210_v5 }
 0xbd0   :  { %1409 = vmatpush.msrb.mxu0 %v1803_v6 }
 0xbd2   :  { %1410 = vmatpush.msrb.mxu0 %v1804_v7 }
 0xbd4   :  { %v1021_v9 = vpop.permute.xlu2 %1020  ;;  %1411 = vmatpush.msrb.mxu0 %v1805_v10 }
 0xbd5   :  { %1026 = vst.msk [vmem:[#allocation10 + $0x12] sm:$0x3] %vm69_vm0, %v1021_v9  ;;  %1636 = vmatmul.msk.f32.vlgmr.msrb.gmra.mxu1 %vm103_vm1, %v1021_v9 }
 0xbd6   :  { %1430 = vmatpush.msrb.mxu1 %v1806_v11 }
 0xbd8   :  { %1431 = vmatpush.msrb.mxu1 %v1807_v15 }
 0xbda   :  { %1432 = vmatpush.msrb.mxu1 %v1808_v18 }
 0xbdc   :  { %1433 = vmatpush.msrb.mxu1 %v1809_v8 }
 0xc4a   :  { %v1049_v16 = vpop.f32.mrf.mxu0 }
 0xc4b   :  { %v1095_v36 = vadd.f32 %v1094_v12, %v1049_v16 }
 0xc4d   :  { %v1120_v37 = vadd.f32 %v2271_v19, %v1095_v36 }
 0xc4f   :  { %v1639_v38 = vmul.f32 -1.442695, %v1120_v37 }
 0xc51   :  { %1746 = vpow2.f32 %v1639_v38 }
 0xc52   :  { %v1071_v39 = vpop.f32.mrf.mxu1  ;;  %v1276_v15 = vpop.f32.mrf.mxu2 }
 0xc53   :  { %v1118_v40 = vadd.f32 %v1117_v25, %v1071_v39 }
 0xc55   :  { %v1121_v42 = vadd.f32 %v2277_v41, %v1118_v40 }
 0xc57   :  { %v1747_v44 = vpop.eup %1746  ;;  %v1640_v45 = vmul.f32 -1.442695, %v1121_v42 }
 0xc58   :  { %v1130_v46 = vadd.f32 1.0, %v1747_v44 }
 0xc59   :  { %1748 = vpow2.f32 %v1640_v45 }
 0xc5a   :  { %1750 = vrcp.f32 %v1130_v46  ;;  %v1143_v52 = vand.u32 2147483648, %v1130_v46  ;;  %v1141_v54 = vand.u32 2147483647, %v1130_v46  ;;  %vm1137_vm7 = vweird.f32 %v1130_v46 }
 0xc5c   :  { %v1144_v26 = vor.u32 1.1754944e-38, %v1143_v52  ;;  %vm1142_vm9 = vcmp.eq.f32.partialorder %v1141_v54, 8.507059e+37 }
 0xc5f   :  { %v1749_v48 = vpop.eup %1748 }
 0xc60   :  { %v1751_v49 = vpop.eup %1750  ;;  %v1131_v27 = vadd.f32 1.0, %v1749_v48 }
 0xc61   :  { %v1133_v50 = vmul.f32 %v1751_v49, %v1130_v46  ;;  %vm1138_vm6 = vweird.f32 %v1751_v49 }
 0xc62   :  { %1752 = vrcp.f32 %v1131_v27  ;;  %vm1139_vm8 = vmor %vm1137_vm7, %vm1138_vm6  ;;  %v1158_v47 = vand.u32 2147483648, %v1131_v27  ;;  %v1156_v14 = vand.u32 2147483647, %v1131_v27  ;;  %vm1152_vm11 = vweird.f32 %v1131_v27 }
 0xc63   :  { %v1134_v32 = vsub.f32 1.0, %v1133_v50  ;;  %1754 = vtanh.f32 %v1120_v37 }
 0xc64   :  { %1756 = vtanh.f32 %v1121_v42  ;;  %v1159_v20 = vor.u32 1.1754944e-38, %v1158_v47  ;;  %vm1157_vm13 = vcmp.eq.f32.partialorder %v1156_v14, 8.507059e+37 }
 0xc65   :  { %v1135_v53 = vmul.f32 %v1751_v49, %v1134_v32 }
 0xc67   :  { %v1136_v55 = vadd.f32 %v1751_v49, %v1135_v53 }
 0xc68   :  { %v1753_v56 = vpop.eup %1752 }
 0xc69   :  { %v1140_v58 = vsel %vm1139_vm8, %v1751_v49, %v1136_v55  ;;  %v1148_v59 = vmul.f32 %v1753_v56, %v1131_v27  ;;  %v1755_v60 = vpop.eup %1754  ;;  %vm1153_vm10 = vweird.f32 %v1753_v56 }
 0xc6a   :  { %v1145_v62 = vsel %vm1142_vm9, %v1144_v26, %v1140_v58  ;;  %vm1154_vm12 = vmor %vm1152_vm11, %vm1153_vm10  ;;  %v1757_v24 = vpop.eup %1756 }
 0xc6b   :  { %v1162_v63 = vsel %vm2064_vm5, %v1755_v60, %v1145_v62  ;;  %v1149_v43 = vsub.f32 1.0, %v1148_v59 }
 0xc6c   :  { %1168 = vrot.lane.b32.xlu0 %v1162_v63, %s1922_s9  ;;  %v1164_v61 = vmul.f32 %v1162_v63, %v2251_v13 }
 0xc6d   :  { %v1150_v0 = vmul.f32 %v1753_v56, %v1149_v43 }
 0xc6f   :  { %v1151_v17 = vadd.f32 %v1753_v56, %v1150_v0 }
 0xc71   :  { %v1155_v23 = vsel %vm1154_vm12, %v1753_v56, %v1151_v17 }
 0xc72   :  { %v1160_v22 = vsel %vm1157_vm13, %v1159_v20, %v1155_v23 }
 0xc73   :  { %v1163_v28 = vsel %vm2064_vm5, %v1757_v24, %v1160_v22 }
 0xc74   :  { %1170 = vrot.lane.b32.xlu1 %v1163_v28, %s1922_s9  ;;  %v1165_v1 = vmul.f32 %v1163_v28, %v2255_v21  ;;  %v1211_v21 = vld [vmem:[#allocation4 + $0x1a] sm:$0x3] }
 0xc75   :  { %1644 = vmatmul.msk.f32.vlgmr.msra.gmra.mxu3 %vm103_vm1, %v1211_v21 }
 0xcde   :  { %v1169_v30 = vpop.permute.xlu0 %1168 }
 0xcdf   :  { %v1174_v29 = vmul.f32 %v1169_v30, %v1162_v63 }
 0xce1   :  { %1178 = vrot.lane.b32.xlu2 %v1174_v29, %s1918_s27 }
 0xce6   :  { %v1171_v31 = vpop.permute.xlu1 %1170 }
 0xce7   :  { %v1175_v57 = vmul.f32 %v1171_v31, %v1163_v28 }
 0xce9   :  { %1180 = vrot.lane.b32.xlu0 %v1175_v57, %s1918_s27 }
 0xcf8   :  { %v1299_v36 = vpop.f32.mrf.mxu3 }
 0xd3b   :  { %v1179_v33 = vpop.permute.xlu2 %1178 }
 0xd3c   :  { %v2289_v34 = vadd.f32 %v1179_v33, %v1164_v61 }
 0xd3e   :  { %1758 = vtanh.f32 %v2289_v34 }
 0xd44   :  { %v1759_v35 = vpop.eup %1758 }
 0xd45   :  { %1190 = vrot.lane.b32.xlu1 %v1759_v35, %s1922_s9 }
 0xd5b   :  { %v1181_v2 = vpop.permute.xlu0 %1180 }
 0xd5c   :  { %v2294_v3 = vadd.f32 %v1181_v2, %v1165_v1 }
 0xd5e   :  { %1760 = vtanh.f32 %v2294_v3 }
 0xd64   :  { %v1761_v4 = vpop.eup %1760 }
 0xd65   :  { %1192 = vrot.lane.b32.xlu2 %v1761_v4, %s1922_s9  ;;  %v1392_v4 = vld [vmem:[#allocation4 + $0x1c] sm:$0x3] }
 0xd66   :  { %1649 = vmatmul.msk.f32.vlgmr.msrb.gmra.mxu2 %vm103_vm1, %v1392_v4 }
 0xdb7   :  { %v1191_v13 = vpop.permute.xlu1 %1190 }
 0xdb8   :  { %v1196_v6 = vmul.f32 %v1191_v13, %v1162_v63 }
 0xdba   :  { %1200 = vrot.lane.b32.xlu0 %v1196_v6, %s1918_s27  ;;  %v1393_v6 = vld [vmem:[#allocation4 + $0x1e] sm:$0x3] }
 0xdbb   :  { %1650 = vmatmul.msk.f32.vlgmr.msrb.gmra.mxu3 %vm103_vm1, %v1393_v6 }
 0xdbf   :  { %v1193_v7 = vpop.permute.xlu2 %1192 }
 0xdc0   :  { %v1197_v9 = vmul.f32 %v1193_v7, %v1163_v28 }
 0xdc2   :  { %1202 = vrot.lane.b32.xlu1 %v1197_v9, %s1918_s27 }
 0xde9   :  { %v1458_v21 = vpop.f32.mrf.mxu2 }
 0xe2c   :  { %v1201_v10 = vpop.permute.xlu0 %1200 }
 0xe2d   :  { %1207 = vst.msk [vmem:[#allocation10 + $0x14] sm:$0x3] %vm69_vm0, %v1201_v10  ;;  %1641 = vmatmul.msk.f32.vlgmr.msra.gmra.mxu0 %vm103_vm1, %v1201_v10 }
 0xe34   :  { %v1203_v11 = vpop.permute.xlu1 %1202 }
 0xe35   :  { %1208 = vst.msk [vmem:[#allocation10 + $0x16] sm:$0x3] %vm69_vm0, %v1203_v11  ;;  %1642 = vmatmul.msk.f32.vlgmr.msra.gmra.mxu1 %vm103_vm1, %v1203_v11 }
 0xeaa   :  { %v1231_v18 = vpop.f32.mrf.mxu0 }
 0xeab   :  { %v1277_v8 = vadd.f32 %v1276_v15, %v1231_v18 }
 0xead   :  { %v1302_v12 = vadd.f32 %v2271_v19, %v1277_v8 }
 0xeaf   :  { %v1645_v16 = vmul.f32 -1.442695, %v1302_v12 }
 0xeb1   :  { %1762 = vpow2.f32 %v1645_v16 }
 0xeb2   :  { %v1253_v37 = vpop.f32.mrf.mxu1 }
 0xeb3   :  { %v1300_v38 = vadd.f32 %v1299_v36, %v1253_v37 }
 0xeb5   :  { %v1303_v25 = vadd.f32 %v2277_v41, %v1300_v38 }
 0xeb7   :  { %v1763_v39 = vpop.eup %1762  ;;  %v1646_v40 = vmul.f32 -1.442695, %v1303_v25 }
 0xeb8   :  { %v1312_v42 = vadd.f32 1.0, %v1763_v39 }
 0xeb9   :  { %1764 = vpow2.f32 %v1646_v40 }
 0xeba   :  { %1766 = vrcp.f32 %v1312_v42  ;;  %v1325_v27 = vand.u32 2147483648, %v1312_v42  ;;  %v1323_v32 = vand.u32 2147483647, %v1312_v42  ;;  %vm1319_vm15 = vweird.f32 %v1312_v42 }
 0xebc   :  { %v1326_v54 = vor.u32 1.1754944e-38, %v1325_v27  ;;  %vm1324_vm3 = vcmp.eq.f32.partialorder %v1323_v32, 8.507059e+37 }
 0xebf   :  { %v1765_v44 = vpop.eup %1764 }
 0xec0   :  { %v1767_v45 = vpop.eup %1766  ;;  %v1313_v46 = vadd.f32 1.0, %v1765_v44 }
 0xec1   :  { %v1315_v48 = vmul.f32 %v1767_v45, %v1312_v42  ;;  %vm1320_vm14 = vweird.f32 %v1767_v45  ;;  %v1481_v42 = vpop.f32.mrf.mxu3 }
 0xec2   :  { %1768 = vrcp.f32 %v1313_v46  ;;  %vm1321_vm2 = vmor %vm1319_vm15, %vm1320_vm14  ;;  %v1340_v62 = vand.u32 2147483648, %v1313_v46  ;;  %v1338_v43 = vand.u32 2147483647, %v1313_v46  ;;  %vm1334_vm6 = vweird.f32 %v1313_v46 }
 0xec3   :  { %v1316_v49 = vsub.f32 1.0, %v1315_v48  ;;  %1770 = vtanh.f32 %v1302_v12 }
 0xec4   :  { %1772 = vtanh.f32 %v1303_v25  ;;  %v1341_v0 = vor.u32 1.1754944e-38, %v1340_v62  ;;  %vm1339_vm8 = vcmp.eq.f32.partialorder %v1338_v43, 8.507059e+37 }
 0xec5   :  { %v1317_v50 = vmul.f32 %v1767_v45, %v1316_v49 }
 0xec7   :  { %v1318_v52 = vadd.f32 %v1767_v45, %v1317_v50 }
 0xec8   :  { %v1769_v53 = vpop.eup %1768 }
 0xec9   :  { %v1322_v55 = vsel %vm1321_vm2, %v1767_v45, %v1318_v52  ;;  %v1330_v56 = vmul.f32 %v1769_v53, %v1313_v46  ;;  %v1771_v26 = vpop.eup %1770  ;;  %vm1335_vm4 = vweird.f32 %v1769_v53 }
 0xeca   :  { %v1327_v58 = vsel %vm1324_vm3, %v1326_v54, %v1322_v55  ;;  %vm1336_vm7 = vmor %vm1334_vm6, %vm1335_vm4  ;;  %v1773_v17 = vpop.eup %1772 }
 0xecb   :  { %v1344_v59 = vsel %vm2064_vm5, %v1771_v26, %v1327_v58  ;;  %v1331_v60 = vsub.f32 1.0, %v1330_v56 }
 0xecc   :  { %1350 = vrot.lane.b32.xlu2 %v1344_v59, %s1922_s9  ;;  %v1346_v29 = vmul.f32 %v1344_v59, %v2289_v34 }
 0xecd   :  { %v1332_v63 = vmul.f32 %v1769_v53, %v1331_v60 }
 0xecf   :  { %v1333_v47 = vadd.f32 %v1769_v53, %v1332_v63 }
 0xed1   :  { %v1337_v14 = vsel %vm1336_vm7, %v1769_v53, %v1333_v47 }
 0xed2   :  { %v1342_v20 = vsel %vm1339_vm8, %v1341_v0, %v1337_v14 }
 0xed3   :  { %v1345_v23 = vsel %vm2064_vm5, %v1773_v17, %v1342_v20 }
 0xed4   :  { %1352 = vrot.lane.b32.xlu0 %v1345_v23, %s1922_s9  ;;  %v1347_v61 = vmul.f32 %v1345_v23, %v2294_v3 }
 0xf26   :  { %v1351_v24 = vpop.permute.xlu2 %1350 }
 0xf27   :  { %v1356_v22 = vmul.f32 %v1351_v24, %v1344_v59 }
 0xf29   :  { %1360 = vrot.lane.b32.xlu1 %v1356_v22, %s1918_s27 }
 0xf46   :  { %v1353_v28 = vpop.permute.xlu0 %1352 }
 0xf47   :  { %v1357_v30 = vmul.f32 %v1353_v28, %v1345_v23 }
 0xf49   :  { %1362 = vrot.lane.b32.xlu2 %v1357_v30, %s1918_s27 }
 0xf9b   :  { %v1361_v31 = vpop.permute.xlu1 %1360 }
 0xf9c   :  { %v2317_v57 = vadd.f32 %v1361_v31, %v1346_v29 }
 0xf9e   :  { %1774 = vtanh.f32 %v2317_v57 }
 0xfa3   :  { %v1363_v33 = vpop.permute.xlu2 %1362 }
 0xfa4   :  { %v1775_v35 = vpop.eup %1774  ;;  %v2321_v1 = vadd.f32 %v1363_v33, %v1347_v61 }
 0xfa5   :  { %1372 = vrot.lane.b32.xlu0 %v1775_v35, %s1922_s9 }
 0xfa6   :  { %1776 = vtanh.f32 %v2321_v1 }
 0xfac   :  { %v1777_v2 = vpop.eup %1776 }
 0xfad   :  { %1374 = vrot.lane.b32.xlu1 %v1777_v2, %s1922_s9 }
0x1017   :  { %v1373_v34 = vpop.permute.xlu0 %1372 }
0x1018   :  { %v1378_v5 = vmul.f32 %v1373_v34, %v1344_v59 }
0x101a   :  { %1382 = vrot.lane.b32.xlu2 %v1378_v5, %s1918_s27 }
0x101f   :  { %v1375_v13 = vpop.permute.xlu1 %1374 }
0x1020   :  { %v1379_v3 = vmul.f32 %v1375_v13, %v1345_v23 }
0x1022   :  { %1384 = vrot.lane.b32.xlu0 %v1379_v3, %s1918_s27 }
0x1074   :  { %v1383_v7 = vpop.permute.xlu2 %1382 }
0x1075   :  { %1389 = vst.msk [vmem:[#allocation10 + $0x18] sm:$0x3] %vm69_vm0, %v1383_v7  ;;  %1647 = vmatmul.msk.f32.vlgmr.msrb.gmra.mxu0 %vm103_vm1, %v1383_v7 }
0x1094   :  { %v1385_v9 = vpop.permute.xlu0 %1384 }
0x1095   :  { %1390 = vst.msk [vmem:[#allocation10 + $0x1a] sm:$0x3] %vm69_vm0, %v1385_v9  ;;  %1648 = vmatmul.msk.f32.vlgmr.msrb.gmra.mxu1 %vm103_vm1, %v1385_v9 }
0x10f2   :  { %v1413_v10 = vpop.f32.mrf.mxu0 }
0x10f3   :  { %v1459_v11 = vadd.f32 %v1458_v21, %v1413_v10 }
0x10f5   :  { %v1484_v15 = vadd.f32 %v2271_v19, %v1459_v11 }
0x10f7   :  { %v1651_v18 = vmul.f32 -1.442695, %v1484_v15 }
0x10f9   :  { %1778 = vpow2.f32 %v1651_v18 }
0x10ff   :  { %v1779_v8 = vpop.eup %1778 }
0x1100   :  { %v1494_v12 = vadd.f32 1.0, %v1779_v8 }
0x1102   :  { %1780 = vrcp.f32 %v1494_v12  ;;  %v1507_v38 = vand.u32 2147483648, %v1494_v12  ;;  %v1505_v39 = vand.u32 2147483647, %v1494_v12  ;;  %vm1501_vm1 = vweird.f32 %v1494_v12 }
0x1103   :  { %1782 = vtanh.f32 %v1484_v15 }
0x1104   :  { %v1508_v44 = vor.u32 1.1754944e-38, %v1507_v38  ;;  %vm1506_vm11 = vcmp.eq.f32.partialorder %v1505_v39, 8.507059e+37 }
0x1108   :  { %v1781_v16 = vpop.eup %1780 }
0x1109   :  { %v1497_v36 = vmul.f32 %v1781_v16, %v1494_v12  ;;  %vm1502_vm9 = vweird.f32 %v1781_v16  ;;  %v1783_v19 = vpop.eup %1782 }
0x110a   :  { %vm1503_vm10 = vmor %vm1501_vm1, %vm1502_vm9 }
0x110b   :  { %v1498_v37 = vsub.f32 1.0, %v1497_v36 }
0x110d   :  { %v1499_v25 = vmul.f32 %v1781_v16, %v1498_v37 }
0x110f   :  { %v1500_v40 = vadd.f32 %v1781_v16, %v1499_v25 }
0x1111   :  { %v1504_v45 = vsel %vm1503_vm10, %v1781_v16, %v1500_v40 }
0x1112   :  { %v1435_v46 = vpop.f32.mrf.mxu1  ;;  %v1509_v48 = vsel %vm1506_vm11, %v1508_v44, %v1504_v45 }
0x1113   :  { %v1482_v49 = vadd.f32 %v1481_v42, %v1435_v46  ;;  %v1526_v27 = vsel %vm2064_vm5, %v1783_v19, %v1509_v48 }
0x1114   :  { %1532 = vrot.lane.b32.xlu1 %v1526_v27, %s1922_s9  ;;  %v1528_v23 = vmul.f32 %v1526_v27, %v2317_v57 }
0x1115   :  { %v1485_v50 = vadd.f32 %v2277_v41, %v1482_v49 }
0x1117   :  { %v1652_v32 = vmul.f32 -1.442695, %v1485_v50 }
0x1119   :  { %1784 = vpow2.f32 %v1652_v32 }
0x111f   :  { %v1785_v52 = vpop.eup %1784 }
0x1120   :  { %v1495_v53 = vadd.f32 1.0, %v1785_v52 }
0x1122   :  { %1786 = vrcp.f32 %v1495_v53  ;;  %v1522_v26 = vand.u32 2147483648, %v1495_v53  ;;  %v1520_v59 = vand.u32 2147483647, %v1495_v53  ;;  %vm1516_vm13 = vweird.f32 %v1495_v53 }
0x1123   :  { %1788 = vtanh.f32 %v1485_v50 }
0x1124   :  { %v1523_v62 = vor.u32 1.1754944e-38, %v1522_v26  ;;  %vm1521_vm15 = vcmp.eq.f32.partialorder %v1520_v59, 8.507059e+37 }
0x1128   :  { %v1787_v54 = vpop.eup %1786 }
0x1129   :  { %v1512_v55 = vmul.f32 %v1787_v54, %v1495_v53  ;;  %vm1517_vm12 = vweird.f32 %v1787_v54  ;;  %v1789_v41 = vpop.eup %1788 }
0x112a   :  { %vm1518_vm14 = vmor %vm1516_vm13, %vm1517_vm12 }
0x112b   :  { %v1513_v56 = vsub.f32 1.0, %v1512_v55 }
0x112d   :  { %v1514_v58 = vmul.f32 %v1787_v54, %v1513_v56 }
0x112f   :  { %v1515_v60 = vadd.f32 %v1787_v54, %v1514_v58 }
0x1131   :  { %v1519_v63 = vsel %vm1518_vm14, %v1787_v54, %v1515_v60 }
0x1132   :  { %v1524_v43 = vsel %vm1521_vm15, %v1523_v62, %v1519_v63 }
0x1133   :  { %v1527_v47 = vsel %vm2064_vm5, %v1789_v41, %v1524_v43 }
0x1134   :  { %1534 = vrot.lane.b32.xlu2 %v1527_v47, %s1922_s9  ;;  %v1529_v28 = vmul.f32 %v1527_v47, %v2321_v1 }
0x1186   :  { %v1533_v0 = vpop.permute.xlu1 %1532 }
0x1187   :  { %v1538_v14 = vmul.f32 %v1533_v0, %v1526_v27 }
0x1189   :  { %1542 = vrot.lane.b32.xlu0 %v1538_v14, %s1918_s27 }
0x118e   :  { %v1535_v17 = vpop.permute.xlu2 %1534 }
0x118f   :  { %v1539_v20 = vmul.f32 %v1535_v17, %v1527_v47 }
0x1191   :  { %1544 = vrot.lane.b32.xlu1 %v1539_v20, %s1918_s27 }
0x11fb   :  { %v1543_v24 = vpop.permute.xlu0 %1542 }
0x11fc   :  { %v1548_v22 = vadd.f32 %v1543_v24, %v1528_v23 }
0x11fe   :  { %1790 = vtanh.f32 %v1548_v22 }
0x1203   :  { %v1545_v30 = vpop.permute.xlu1 %1544 }
0x1204   :  { %v1791_v51 = vpop.eup %1790  ;;  %v1549_v29 = vadd.f32 %v1545_v30, %v1529_v28 }
0x1205   :  { %1554 = vrot.lane.b32.xlu2 %v1791_v51, %s1922_s9 }
0x1206   :  { %1792 = vtanh.f32 %v1549_v29 }
0x120c   :  { %v1793_v31 = vpop.eup %1792 }
0x120d   :  { %1556 = vrot.lane.b32.xlu0 %v1793_v31, %s1922_s9 }
0x1215   :  { %1577 = vrot.lane.b32.xlu0 %v1548_v22, %s1923_s3 }
0x125f   :  { %v1555_v61 = vpop.permute.xlu2 %1554 }
0x1260   :  { %v1560_v33 = vmul.f32 %v1555_v61, %v1526_v27 }
0x1262   :  { %1564 = vrot.lane.b32.xlu1 %v1560_v33, %s1918_s27 }
0x126a   :  { %1579 = vrot.lane.b32.xlu1 %v1549_v29, %s1923_s3 }
0x127f   :  { %v1557_v57 = vpop.permute.xlu0 %1556 }
0x1280   :  { %v1561_v35 = vmul.f32 %v1557_v57, %v1527_v47 }
0x1282   :  { %1566 = vrot.lane.b32.xlu2 %v1561_v35, %s1918_s27 }
0x1287   :  { %v1578_v1 = vpop.permute.xlu0 %1577 }
0x1288   :  { %1583 = vst.msk [vmem:[#allocation3] sm:$0x3] %vm69_vm0, %v1578_v1 }
0x12d4   :  { %v1565_v2 = vpop.permute.xlu1 %1564 }
0x12d5   :  { %1571 = vst.msk [vmem:[#allocation10 + $0x1c] sm:$0x3] %vm69_vm0, %v1565_v2 }
0x12d6   :  { %1573 = vst.msk [vmem:[#allocation2] sm:$0x3] %vm69_vm0, %v1565_v2 }
0x12dc   :  { %v1580_v4 = vpop.permute.xlu1 %1579  ;;  %v1567_v34 = vpop.permute.xlu2 %1566 }
0x12dd   :  { %1584 = vst.msk [vmem:[#allocation3 + $0x2] sm:$0x3] %vm69_vm0, %v1580_v4 }
0x12de   :  { %1572 = vst.msk [vmem:[#allocation10 + $0x1e] sm:$0x3] %vm69_vm0, %v1567_v34 }
0x12df   :  { %1574 = vst.msk [vmem:[#allocation2 + $0x2] sm:$0x3] %vm69_vm0, %v1567_v34  ;;  %1597 = dma.vmem_to_hbm [thread:$0]  %s1590_s15, 512, %s1592_s18, [#allocation6], %s1918_s27, %s1918_s27, %s1919_s28  }
0x12e0   :  { %1912 = dma.done.wait [#allocation6], 512  }
0x12e1   :  { %1913 = vsyncadd [#allocation6], 4294966784 }
0x12e2   :  { %1602 = vsyncpa [#allocation5], 1 }
0x12e3   :  { %1603 = vsyncpa [#allocation8], 1 }
0x12e4   :  { %1604 = vsyncpa [#allocation6], 1 }

</bundles_post_ra>
